<compile_context>
chip_gen: v7x
topology: tpu7x:2x2x1
jax: 0.10.0
libtpu: 0.0.40
codegen_flags: <defaults>
</compile_context>

<pallas_src>
import jax
import jax.numpy as jnp
from jax.experimental import pallas as pl
from jax.experimental.pallas import tpu as pltpu


def _csd_kernel(img_ref, coef_ref, content_ref, style_ref):
    c = pl.program_id(1)
    x = img_ref[0, 0]                       # (H, W) f32, W on lanes
    H, W = x.shape

    # Parity / border masks (built once per grid step, reused by all passes).
    ri = jax.lax.broadcasted_iota(jnp.int32, (H, W), 0)
    ci = jax.lax.broadcasted_iota(jnp.int32, (H, W), 1)
    row_first = ri == 0
    row_lo2 = ri == H - 2
    row_last = ri == H - 1
    row_even = (ri & 1) == 0
    col_first = ci == 0
    col_lo2 = ci == W - 2
    col_last = ci == W - 1
    col_even = (ci & 1) == 0

    def sh_r(a, s):                         # result[i] = a[i - s]  (cyclic)
        return pltpu.roll(a, s % H, 0)      # sublane rotate (XLU)

    def sh_c(a, s):                         # result[j] = a[j - s]  (cyclic)
        return pltpu.roll(a, s % W, 1)      # lane rotate (XLU)

    # ---- first gaussian: conv_gauss(img, K), separable [1,4,6,4,1]/16 ------
    # Only its even-row / even-col samples survive the ::2 downsample, so the
    # reflect fix-ups are only applied where an even row / col is affected
    # (row 0 and row H-2; col 0 and col W-2).
    def gauss_rows(a):
        u1, d1 = sh_r(a, 1), sh_r(a, -1)
        u2, d2 = sh_r(a, 2), sh_r(a, -2)
        u1 = jnp.where(row_first, d1, u1)   # pad[-1] = a[1]
        u2 = jnp.where(row_first, d2, u2)   # pad[-2] = a[2]
        d2 = jnp.where(row_lo2, a, d2)      # pad[H]  = a[H-2]
        return ((u2 + d2) * (1.0 / 16.0) + (u1 + d1) * (4.0 / 16.0)
                + a * (6.0 / 16.0))

    def gauss_cols(a):
        l1, r1 = sh_c(a, 1), sh_c(a, -1)
        l2, r2 = sh_c(a, 2), sh_c(a, -2)
        l1 = jnp.where(col_first, r1, l1)   # pad[-1] = a[:,1]
        l2 = jnp.where(col_first, r2, l2)   # pad[-2] = a[:,2]
        r2 = jnp.where(col_lo2, a, r2)      # pad[W]  = a[:,W-2]
        return ((l2 + r2) * (1.0 / 16.0) + (l1 + r1) * (4.0 / 16.0)
                + a * (6.0 / 16.0))

    # ---- second gaussian on the zero-interleaved downsample (polyphase) ----
    # conv_gauss(upsample(downsample(filtered)), 4*K): per axis the taps are
    # k/8; even outputs only see the nonzero (even) samples through offsets
    # {-2, 0, +2} -> [1, 6, 1]/8, odd outputs through {-1, +1} -> [4, 4]/8.
    # No mask multiply is ever materialized.
    def up_cols(a):
        l1, r1 = sh_c(a, 1), sh_c(a, -1)
        l2, r2 = sh_c(a, 2), sh_c(a, -2)
        l2 = jnp.where(col_first, r2, l2)   # reflect: pad[-2] = a[:,2]
        r2 = jnp.where(col_lo2, a, r2)      # pad[W] = a[:,W-2]
        r1 = jnp.where(col_last, l1, r1)    # pad[W] = a[:,W-2]
        even = (l2 + r2) * (1.0 / 8.0) + a * (6.0 / 8.0)
        odd = (l1 + r1) * 0.5
        return jnp.where(col_even, even, odd)

    def up_rows(a):
        u1, d1 = sh_r(a, 1), sh_r(a, -1)
        u2, d2 = sh_r(a, 2), sh_r(a, -2)
        u2 = jnp.where(row_first, d2, u2)   # reflect: pad[-2] = a[2]
        d2 = jnp.where(row_lo2, a, d2)      # pad[H] = a[H-2]
        d1 = jnp.where(row_last, u1, d1)    # pad[H] = a[H-2]
        even = (u2 + d2) * (1.0 / 8.0) + a * (6.0 / 8.0)
        odd = (u1 + d1) * 0.5
        return jnp.where(row_even, even, odd)

    filt = gauss_cols(gauss_rows(x))        # valid at even rows & even cols
    up = up_rows(up_cols(filt))             # valid everywhere

    style_ref[0, 0] = up.astype(style_ref.dtype)

    # content accumulation across the C grid axis; coef = lum_coef[c] * scale
    # was pre-folded in the wrapper (SMEM scalar).
    v = ((x - up) * coef_ref[c]).astype(content_ref.dtype)

    @pl.when(c == 0)
    def _():
        content_ref[0, 0] = v

    @pl.when(c != 0)
    def _():
        content_ref[0, 0] += v


def content_style_separation(img_nchw, scale):
    """Forward pass. img_nchw: (N, 3, H, W) f32, H, W even and >= 8.

    Returns (content (N,1,H,W), style (N,3,H,W)).
    """
    N, C, H, W = img_nchw.shape
    if C != 3:
        raise ValueError("Content_Style_Separation expects 3 channels")
    if H % 2 or W % 2 or H < 8 or W < 8:
        raise ValueError("H and W must be even and >= 8")

    # Fold the random content-jitter scale into the luminance coefficients.
    coefs = (jnp.asarray([0.299, 0.587, 0.114], jnp.float32)
             * jnp.asarray(scale, jnp.float32))

    # Explicit scoped-VMEM budget: one (H, W) plane per step in/out (double
    # buffered) plus ~a dozen live temporaries; clamp to a range legal on all
    # generations.
    plane_bytes = H * W * img_nchw.dtype.itemsize
    vmem_limit = int(min(max(32 * 1024 * 1024, 24 * plane_bytes),
                         96 * 1024 * 1024))

    content, style = pl.pallas_call(
        _csd_kernel,
        out_shape=(
            jax.ShapeDtypeStruct((N, 1, H, W), img_nchw.dtype),   # content
            jax.ShapeDtypeStruct((N, C, H, W), img_nchw.dtype),   # style
        ),
        grid_spec=pltpu.PrefetchScalarGridSpec(
            num_scalar_prefetch=0,
            grid=(N, C),
            in_specs=[
                pl.BlockSpec((1, 1, H, W), lambda n, c: (n, c, 0, 0)),
                pl.BlockSpec(memory_space=pltpu.MemorySpace.SMEM),  # coefs
            ],
            out_specs=(
                # content block ignores c -> stays resident, accumulated.
                pl.BlockSpec((1, 1, H, W), lambda n, c: (n, 0, 0, 0)),
                pl.BlockSpec((1, 1, H, W), lambda n, c: (n, c, 0, 0)),
            ),
        ),
        compiler_params=pltpu.CompilerParams(
            dimension_semantics=("parallel", "arbitrary"),
            vmem_limit_bytes=vmem_limit,
        ),
    )(img_nchw, coefs)
    return content, style


# ---------------------------------------------------------------------------
# Pure-JAX reference (mirrors the PyTorch module literally) for validation.
# ---------------------------------------------------------------------------
def _ref_forward(img, scale):
    k1 = jnp.array([1.0, 4.0, 6.0, 4.0, 1.0], jnp.float32)
    k2 = jnp.outer(k1, k1) / 256.0
    C = img.shape[1]

    def conv_gauss(x, kmul):
        xp = jnp.pad(x, ((0, 0), (0, 0), (2, 2), (2, 2)), mode="reflect")
        w = jnp.tile((k2 * kmul)[None, None, :, :], (C, 1, 1, 1))
        return jax.lax.conv_general_dilated(
            xp, w, window_strides=(1, 1), padding="VALID",
            dimension_numbers=("NCHW", "OIHW", "NCHW"),
            feature_group_count=C,
            precision=jax.lax.Precision.HIGHEST)

    filtered = conv_gauss(img, 1.0)
    down = filtered[:, :, ::2, ::2]
    up_zero = jnp.zeros_like(img).at[:, :, ::2, ::2].set(down)
    up = conv_gauss(up_zero, 4.0)
    content = img - up
    content = (0.299 * content[:, 0:1] + 0.587 * content[:, 1:2]
               + 0.114 * content[:, 2:3])
    return content * scale, up


if __name__ == "__main__":
    # Small but lane/sublane-aligned demo shape (W multiple of 128, H of 8).
    N, C, H, W = 2, 3, 128, 128

    key = jax.random.PRNGKey(0)
    k_img, k_scale = jax.random.split(key)
    img = jax.random.normal(k_img, (N, C, H, W), jnp.float32)
    # TODO(synk): original uses host-side random.random(); replaced with a
    # deterministic jax.random scalar in [0.6, 1.2) passed into the kernel.
    scale = 0.6 + 0.6 * jax.random.uniform(k_scale, (), jnp.float32)

    fwd = jax.jit(content_style_separation)
    content, style = jax.block_until_ready(fwd(img, scale))

    assert content.shape == (N, 1, H, W), content.shape
    assert style.shape == (N, C, H, W), style.shape
    assert bool(jnp.all(jnp.isfinite(content))) and bool(jnp.all(jnp.isfinite(style)))

    ref_content, ref_style = _ref_forward(img, scale)
    assert bool(jnp.allclose(style, ref_style, atol=1e-4, rtol=1e-4)), \
        float(jnp.max(jnp.abs(style - ref_style)))
    assert bool(jnp.allclose(content, ref_content, atol=1e-4, rtol=1e-4)), \
        float(jnp.max(jnp.abs(content - ref_content)))

    print("KERNEL_OK")
</pallas_src>

<mosaic_0001>
module attributes {stable_mosaic.version = 11 : i64} {
  func.func @_csd_kernel(%arg0: i32, %arg1: i32, %arg2: memref<1x1x128x128xf32, #tpu.memory_space<vmem>>, %arg3: memref<3xf32, #tpu.memory_space<smem>>, %arg4: memref<1x1x128x128xf32, #tpu.memory_space<vmem>>, %arg5: memref<1x1x128x128xf32, #tpu.memory_space<vmem>>) attributes {dimension_semantics = [#tpu.dimension_semantics<parallel>, #tpu.dimension_semantics<arbitrary>], iteration_bounds = array<i64: 2, 3>, scalar_prefetch = 0 : i64, scratch_operands = 0 : i64, tpu.core_type = #tpu.core_type<tc>, window_params = [{transform_indices = @transform_0, window_bounds = array<i64: 1, 1, 128, 128>}, {transform_indices = @transform_1, window_bounds = array<i64: 3>}, {transform_indices = @transform_2, window_bounds = array<i64: 1, 1, 128, 128>}, {transform_indices = @transform_3, window_bounds = array<i64: 1, 1, 128, 128>}]} {
    %c0 = arith.constant 0 : index
    %c0_0 = arith.constant 0 : index
    %c0_1 = arith.constant 0 : index
    %c0_2 = arith.constant 0 : index
    %0 = vector.load %arg2[%c0, %c0_0, %c0_1, %c0_2] : memref<1x1x128x128xf32, #tpu.memory_space<vmem>>, vector<1x1x128x128xf32>
    %1 = vector.shape_cast %0 : vector<1x1x128x128xf32> to vector<128x128xf32>
    %2 = tpu.iota {dimensions = array<i32: 0>} : vector<128x128xi32>
    %3 = tpu.iota {dimensions = array<i32: 1>} : vector<128x128xi32>
    %c0_i32 = arith.constant 0 : i32
    %4 = vector.broadcast %c0_i32 : i32 to vector<128x128xi32>
    %5 = arith.cmpi eq, %2, %4 : vector<128x128xi32>
    %c126_i32 = arith.constant 126 : i32
    %6 = vector.broadcast %c126_i32 : i32 to vector<128x128xi32>
    %7 = arith.cmpi eq, %2, %6 : vector<128x128xi32>
    %c127_i32 = arith.constant 127 : i32
    %8 = vector.broadcast %c127_i32 : i32 to vector<128x128xi32>
    %9 = arith.cmpi eq, %2, %8 : vector<128x128xi32>
    %c1_i32 = arith.constant 1 : i32
    %10 = vector.broadcast %c1_i32 : i32 to vector<128x128xi32>
    %11 = arith.andi %2, %10 : vector<128x128xi32>
    %c0_i32_3 = arith.constant 0 : i32
    %12 = vector.broadcast %c0_i32_3 : i32 to vector<128x128xi32>
    %13 = arith.cmpi eq, %11, %12 : vector<128x128xi32>
    %c0_i32_4 = arith.constant 0 : i32
    %14 = vector.broadcast %c0_i32_4 : i32 to vector<128x128xi32>
    %15 = arith.cmpi eq, %3, %14 : vector<128x128xi32>
    %c126_i32_5 = arith.constant 126 : i32
    %16 = vector.broadcast %c126_i32_5 : i32 to vector<128x128xi32>
    %17 = arith.cmpi eq, %3, %16 : vector<128x128xi32>
    %c127_i32_6 = arith.constant 127 : i32
    %18 = vector.broadcast %c127_i32_6 : i32 to vector<128x128xi32>
    %19 = arith.cmpi eq, %3, %18 : vector<128x128xi32>
    %c1_i32_7 = arith.constant 1 : i32
    %20 = vector.broadcast %c1_i32_7 : i32 to vector<128x128xi32>
    %21 = arith.andi %3, %20 : vector<128x128xi32>
    %c0_i32_8 = arith.constant 0 : i32
    %22 = vector.broadcast %c0_i32_8 : i32 to vector<128x128xi32>
    %23 = arith.cmpi eq, %21, %22 : vector<128x128xi32>
    %c1_i32_9 = arith.constant 1 : i32
    %24 = tpu.dynamic_rotate %1 by %c1_i32_9 dim 0 : vector<128x128xf32>, i32 -> vector<128x128xf32>
    %c127_i32_10 = arith.constant 127 : i32
    %25 = tpu.dynamic_rotate %1 by %c127_i32_10 dim 0 : vector<128x128xf32>, i32 -> vector<128x128xf32>
    %c2_i32 = arith.constant 2 : i32
    %26 = tpu.dynamic_rotate %1 by %c2_i32 dim 0 : vector<128x128xf32>, i32 -> vector<128x128xf32>
    %c126_i32_11 = arith.constant 126 : i32
    %27 = tpu.dynamic_rotate %1 by %c126_i32_11 dim 0 : vector<128x128xf32>, i32 -> vector<128x128xf32>
    %28 = arith.select %5, %25, %24 : vector<128x128xi1>, vector<128x128xf32>
    %29 = arith.select %5, %27, %26 : vector<128x128xi1>, vector<128x128xf32>
    %30 = arith.select %7, %1, %27 : vector<128x128xi1>, vector<128x128xf32>
    %31 = arith.addf %29, %30 : vector<128x128xf32>
    %cst = arith.constant 6.250000e-02 : f32
    %32 = vector.broadcast %cst : f32 to vector<128x128xf32>
    %33 = arith.mulf %31, %32 : vector<128x128xf32>
    %34 = arith.addf %28, %25 : vector<128x128xf32>
    %cst_12 = arith.constant 2.500000e-01 : f32
    %35 = vector.broadcast %cst_12 : f32 to vector<128x128xf32>
    %36 = arith.mulf %34, %35 : vector<128x128xf32>
    %37 = arith.addf %33, %36 : vector<128x128xf32>
    %cst_13 = arith.constant 3.750000e-01 : f32
    %38 = vector.broadcast %cst_13 : f32 to vector<128x128xf32>
    %39 = arith.mulf %1, %38 : vector<128x128xf32>
    %40 = arith.addf %37, %39 : vector<128x128xf32>
    %c1_i32_14 = arith.constant 1 : i32
    %41 = tpu.dynamic_rotate %40 by %c1_i32_14 dim 1 : vector<128x128xf32>, i32 -> vector<128x128xf32>
    %c127_i32_15 = arith.constant 127 : i32
    %42 = tpu.dynamic_rotate %40 by %c127_i32_15 dim 1 : vector<128x128xf32>, i32 -> vector<128x128xf32>
    %c2_i32_16 = arith.constant 2 : i32
    %43 = tpu.dynamic_rotate %40 by %c2_i32_16 dim 1 : vector<128x128xf32>, i32 -> vector<128x128xf32>
    %c126_i32_17 = arith.constant 126 : i32
    %44 = tpu.dynamic_rotate %40 by %c126_i32_17 dim 1 : vector<128x128xf32>, i32 -> vector<128x128xf32>
    %45 = arith.select %15, %42, %41 : vector<128x128xi1>, vector<128x128xf32>
    %46 = arith.select %15, %44, %43 : vector<128x128xi1>, vector<128x128xf32>
    %47 = arith.select %17, %40, %44 : vector<128x128xi1>, vector<128x128xf32>
    %48 = arith.addf %46, %47 : vector<128x128xf32>
    %cst_18 = arith.constant 6.250000e-02 : f32
    %49 = vector.broadcast %cst_18 : f32 to vector<128x128xf32>
    %50 = arith.mulf %48, %49 : vector<128x128xf32>
    %51 = arith.addf %45, %42 : vector<128x128xf32>
    %cst_19 = arith.constant 2.500000e-01 : f32
    %52 = vector.broadcast %cst_19 : f32 to vector<128x128xf32>
    %53 = arith.mulf %51, %52 : vector<128x128xf32>
    %54 = arith.addf %50, %53 : vector<128x128xf32>
    %cst_20 = arith.constant 3.750000e-01 : f32
    %55 = vector.broadcast %cst_20 : f32 to vector<128x128xf32>
    %56 = arith.mulf %40, %55 : vector<128x128xf32>
    %57 = arith.addf %54, %56 : vector<128x128xf32>
    %c1_i32_21 = arith.constant 1 : i32
    %58 = tpu.dynamic_rotate %57 by %c1_i32_21 dim 1 : vector<128x128xf32>, i32 -> vector<128x128xf32>
    %c127_i32_22 = arith.constant 127 : i32
    %59 = tpu.dynamic_rotate %57 by %c127_i32_22 dim 1 : vector<128x128xf32>, i32 -> vector<128x128xf32>
    %c2_i32_23 = arith.constant 2 : i32
    %60 = tpu.dynamic_rotate %57 by %c2_i32_23 dim 1 : vector<128x128xf32>, i32 -> vector<128x128xf32>
    %c126_i32_24 = arith.constant 126 : i32
    %61 = tpu.dynamic_rotate %57 by %c126_i32_24 dim 1 : vector<128x128xf32>, i32 -> vector<128x128xf32>
    %62 = arith.select %15, %61, %60 : vector<128x128xi1>, vector<128x128xf32>
    %63 = arith.select %17, %57, %61 : vector<128x128xi1>, vector<128x128xf32>
    %64 = arith.select %19, %58, %59 : vector<128x128xi1>, vector<128x128xf32>
    %65 = arith.addf %62, %63 : vector<128x128xf32>
    %cst_25 = arith.constant 1.250000e-01 : f32
    %66 = vector.broadcast %cst_25 : f32 to vector<128x128xf32>
    %67 = arith.mulf %65, %66 : vector<128x128xf32>
    %cst_26 = arith.constant 7.500000e-01 : f32
    %68 = vector.broadcast %cst_26 : f32 to vector<128x128xf32>
    %69 = arith.mulf %57, %68 : vector<128x128xf32>
    %70 = arith.addf %67, %69 : vector<128x128xf32>
    %71 = arith.addf %58, %64 : vector<128x128xf32>
    %cst_27 = arith.constant 5.000000e-01 : f32
    %72 = vector.broadcast %cst_27 : f32 to vector<128x128xf32>
    %73 = arith.mulf %71, %72 : vector<128x128xf32>
    %74 = arith.select %23, %70, %73 : vector<128x128xi1>, vector<128x128xf32>
    %c1_i32_28 = arith.constant 1 : i32
    %75 = tpu.dynamic_rotate %74 by %c1_i32_28 dim 0 : vector<128x128xf32>, i32 -> vector<128x128xf32>
    %c127_i32_29 = arith.constant 127 : i32
    %76 = tpu.dynamic_rotate %74 by %c127_i32_29 dim 0 : vector<128x128xf32>, i32 -> vector<128x128xf32>
    %c2_i32_30 = arith.constant 2 : i32
    %77 = tpu.dynamic_rotate %74 by %c2_i32_30 dim 0 : vector<128x128xf32>, i32 -> vector<128x128xf32>
    %c126_i32_31 = arith.constant 126 : i32
    %78 = tpu.dynamic_rotate %74 by %c126_i32_31 dim 0 : vector<128x128xf32>, i32 -> vector<128x128xf32>
    %79 = arith.select %5, %78, %77 : vector<128x128xi1>, vector<128x128xf32>
    %80 = arith.select %7, %74, %78 : vector<128x128xi1>, vector<128x128xf32>
    %81 = arith.select %9, %75, %76 : vector<128x128xi1>, vector<128x128xf32>
    %82 = arith.addf %79, %80 : vector<128x128xf32>
    %cst_32 = arith.constant 1.250000e-01 : f32
    %83 = vector.broadcast %cst_32 : f32 to vector<128x128xf32>
    %84 = arith.mulf %82, %83 : vector<128x128xf32>
    %cst_33 = arith.constant 7.500000e-01 : f32
    %85 = vector.broadcast %cst_33 : f32 to vector<128x128xf32>
    %86 = arith.mulf %74, %85 : vector<128x128xf32>
    %87 = arith.addf %84, %86 : vector<128x128xf32>
    %88 = arith.addf %75, %81 : vector<128x128xf32>
    %cst_34 = arith.constant 5.000000e-01 : f32
    %89 = vector.broadcast %cst_34 : f32 to vector<128x128xf32>
    %90 = arith.mulf %88, %89 : vector<128x128xf32>
    %91 = arith.select %13, %87, %90 : vector<128x128xi1>, vector<128x128xf32>
    %c0_35 = arith.constant 0 : index
    %c0_36 = arith.constant 0 : index
    %c0_37 = arith.constant 0 : index
    %c0_38 = arith.constant 0 : index
    %92 = vector.load %arg5[%c0_35, %c0_36, %c0_37, %c0_38] : memref<1x1x128x128xf32, #tpu.memory_space<vmem>>, vector<1x1x128x128xf32>
    %93 = vector.shape_cast %92 : vector<1x1x128x128xf32> to vector<128x128xf32>
    %94 = vector.shape_cast %91 : vector<128x128xf32> to vector<1x1x128x128xf32>
    tpu.vector_store %arg5[%c0_35, %c0_36, %c0_37, %c0_38], %94 {strides = array<i32>} : memref<1x1x128x128xf32, #tpu.memory_space<vmem>>, vector<1x1x128x128xf32>,
    %95 = arith.subf %1, %91 : vector<128x128xf32>
    %96 = arith.index_cast %arg1 : i32 to index
    %97 = memref.load %arg3[%96] : memref<3xf32, #tpu.memory_space<smem>>
    %98 = vector.broadcast %97 : f32 to vector<128x128xf32>
    %99 = arith.mulf %95, %98 : vector<128x128xf32>
    %c0_i32_39 = arith.constant 0 : i32
    %100 = arith.cmpi eq, %arg1, %c0_i32_39 : i32
    %101 = arith.extui %100 : i1 to i32
    %c0_i32_40 = arith.constant 0 : i32
    %102 = arith.cmpi ne, %101, %c0_i32_40 : i32
    scf.if %102 {
      %c0_43 = arith.constant 0 : index
      %c0_44 = arith.constant 0 : index
      %c0_45 = arith.constant 0 : index
      %c0_46 = arith.constant 0 : index
      %106 = vector.load %arg4[%c0_43, %c0_44, %c0_45, %c0_46] : memref<1x1x128x128xf32, #tpu.memory_space<vmem>>, vector<1x1x128x128xf32>
      %107 = vector.shape_cast %106 : vector<1x1x128x128xf32> to vector<128x128xf32>
      %108 = vector.shape_cast %99 : vector<128x128xf32> to vector<1x1x128x128xf32>
      tpu.vector_store %arg4[%c0_43, %c0_44, %c0_45, %c0_46], %108 {strides = array<i32>} : memref<1x1x128x128xf32, #tpu.memory_space<vmem>>, vector<1x1x128x128xf32>,
    } else {
    }
    %c0_i32_41 = arith.constant 0 : i32
    %103 = arith.cmpi ne, %arg1, %c0_i32_41 : i32
    %104 = arith.extui %103 : i1 to i32
    %c0_i32_42 = arith.constant 0 : i32
    %105 = arith.cmpi ne, %104, %c0_i32_42 : i32
    scf.if %105 {
      %c0_43 = arith.constant 0 : index
      %c0_44 = arith.constant 0 : index
      %c0_45 = arith.constant 0 : index
      %c0_46 = arith.constant 0 : index
      %106 = vector.load %arg4[%c0_43, %c0_44, %c0_45, %c0_46] : memref<1x1x128x128xf32, #tpu.memory_space<vmem>>, vector<1x1x128x128xf32>
      %107 = vector.shape_cast %106 : vector<1x1x128x128xf32> to vector<128x128xf32>
      %108 = arith.addf %107, %99 : vector<128x128xf32>
      %c0_47 = arith.constant 0 : index
      %c0_48 = arith.constant 0 : index
      %c0_49 = arith.constant 0 : index
      %c0_50 = arith.constant 0 : index
      %109 = vector.load %arg4[%c0_47, %c0_48, %c0_49, %c0_50] : memref<1x1x128x128xf32, #tpu.memory_space<vmem>>, vector<1x1x128x128xf32>
      %110 = vector.shape_cast %109 : vector<1x1x128x128xf32> to vector<128x128xf32>
      %111 = vector.shape_cast %108 : vector<128x128xf32> to vector<1x1x128x128xf32>
      tpu.vector_store %arg4[%c0_47, %c0_48, %c0_49, %c0_50], %111 {strides = array<i32>} : memref<1x1x128x128xf32, #tpu.memory_space<vmem>>, vector<1x1x128x128xf32>,
    } else {
    }
    return
  }
  func.func @transform_0(%arg0: i32, %arg1: i32) -> (i32, i32, i32, i32) {
    %c0_i32 = arith.constant 0 : i32
    %c0_i32_0 = arith.constant 0 : i32
    %c0_i32_1 = arith.constant 0 : i32
    return %arg0, %arg1, %c0_i32, %c0_i32_0 : i32, i32, i32, i32
  }
  func.func @transform_1(%arg0: i32, %arg1: i32) -> i32 {
    %c0_i32 = arith.constant 0 : i32
    %c0_i32_0 = arith.constant 0 : i32
    return %c0_i32 : i32
  }
  func.func @transform_2(%arg0: i32, %arg1: i32) -> (i32, i32, i32, i32) {
    %c0_i32 = arith.constant 0 : i32
    %c0_i32_0 = arith.constant 0 : i32
    %c0_i32_1 = arith.constant 0 : i32
    %c0_i32_2 = arith.constant 0 : i32
    return %arg0, %c0_i32, %c0_i32_0, %c0_i32_1 : i32, i32, i32, i32
  }
  func.func @transform_3(%arg0: i32, %arg1: i32) -> (i32, i32, i32, i32) {
    %c0_i32 = arith.constant 0 : i32
    %c0_i32_0 = arith.constant 0 : i32
    %c0_i32_1 = arith.constant 0 : i32
    return %arg0, %arg1, %c0_i32, %c0_i32_0 : i32, i32, i32, i32
  }
}

</mosaic_0001>

<bundles_post_ra>
// kernel: content_style_separation.1
= control target key start
LH: loop header
LB: loop body
LE: loop exit
PB: predicated region body
PF: predicated region fallthrough
CT: control target
= control target key end

     0   :  { %s4387_s0 = inlined_call_operand.hbm [shape: f32[2,3,128,128], index: 0, kind: input, shape index: {}]   ;;  %s4388_s1 = inlined_call_operand.vmem [shape: f32[3], index: 1, kind: input, shape index: {}]   ;;  %s4389_s2 = inlined_call_operand.hbm [shape: f32[2,1,128,128], index: 2, kind: output, shape index: {0}]   ;;  %s4390_s3 = inlined_call_operand.hbm [shape: f32[2,3,128,128], index: 3, kind: output, shape index: {1}]  }
   0x1   :  { %4444 = sst [smem:[#allocation53_spill]] %s4388_s1 }
   0x2   :  { %9 = vsyncpa [#allocation3], 0 }
   0x3   :  { %11 = vsyncpa [#allocation3 + $0x1], 0 }
   0x4   :  { %12 = vsyncpa [#allocation5], 0 }
   0x5   :  { %13 = vsyncpa [#allocation4], 0 }
   0x6   :  { %15 = vsyncpa [#allocation4 + $0x1], 0 }
   0x7   :  { %16 = vsyncpa [#allocation9], 0 }
   0x8   :  { %18 = vsyncpa [#allocation9 + $0x1], 0  ;;  %s2206_s12 = smov 0   ;;  %s2208_s13 = smov 0  }
   0x9   :  { %s2210_s14 = smov 0   ;;  %s2212_s15 = smov 0  }
   0xa   :  { %s2214_s16 = smov 0   ;;  %s2216_s17 = smov 0  }
   0xb   :  { %s2218_s18 = smov 0   ;;  %s2220_s19 = smov 0  }
   0xc   :  { %s2222_s20 = smov 0   ;;  %s2224_s21 = smov 0  }
   0xd   :  { %s2226_s22 = smov 0  }
   0xe LB: > { %4445 = sst [smem:[#allocation14_spill]] %s2132_s12  ;;  %s1801_s23 = sadd.s32 4294967295, %s2172_s22   ;;  %s2172_s22 = sphi %s2226_s22, %s24_s22   ;;  %s2168_s21 = sphi %s2224_s21, %s4639_s21   ;;  %s2164_s20 = sphi %s2222_s20, %s4630_s20   ;;  %s2160_s19 = sphi %s2220_s19, %s4638_s19   ;;  %s2156_s18 = sphi %s2218_s18, %s4629_s18   ;;  %s2152_s17 = sphi %s2216_s17, %s4637_s17   ;;  %s2148_s16 = sphi %s2214_s16, %s4636_s16   ;;  %s2144_s15 = sphi %s2212_s15, %s4635_s15   ;;  %s2140_s14 = sphi %s2210_s14, %s4634_s14   ;;  %s2136_s13 = sphi %s2208_s13, %s4633_s13   ;;  %s2132_s12 = sphi %s2206_s12, %s4632_s12  }
   0xf   : > { %4446 = sst [smem:[#allocation15_spill]] %s2144_s15  ;;  %s1802_s24 = sadd.s32 4294967294, %s2172_s22  }
  0x10   : > { %4447 = sst [smem:[#allocation16_spill]] %s2164_s20  ;;  %p52_p0 = scmp.ne.s32.totalorder %s2152_s17, %s2148_s16 }
  0x11   : > { %4448 = sst [smem:[#allocation17_spill]] %s2172_s22  ;;  %p53_p1 = scmp.eq.s32.totalorder %s2172_s22, 0 }
  0x12   : > { %p58_p2 = scmp.ne.s32.totalorder %s2148_s16, %s2144_s15  ;;  %p2269_p3 = scmp.eq.s32.totalorder %s1801_s23, 0 }
  0x13   : > { %p2274_p4 = por %p53_p1, %p52_p0  ;;  %p102_p5 = scmp.ne.s32.totalorder %s2140_s14, %s2136_s13 }
  0x14   : > { %p2282_p6 = por %p2269_p3, %p58_p2  ;;  %p103_p7 = scmp.eq.s32.totalorder %s1801_s23, 5 }
  0x15   : > { %p108_p8 = scmp.ne.s32.totalorder %s2136_s13, %s2132_s12  ;;  %p109_p9 = scmp.eq.s32.totalorder %s1802_s24, 5 }
  0x16   : > { %s4451_s29 = scalar_select %p2282_p6, 1, 0 }
  0x17   : > { %p2288_p10 = por %p103_p7, %p102_p5  ;;  %p2292_p11 = por %p103_p7, %p52_p0 }
  0x18   : > { %p2296_p12 = por %p109_p9, %p108_p8  ;;  %p2300_p13 = por %p109_p9, %p58_p2 }
  0x19   : > { %s4452_s30 = scalar_select %p2288_p10, 1, 0 }
  0x1a   : > { %s4453_s4 = scalar_select %p2292_p11, 1, 0 }
  0x1b   : > { %s4454_s5 = scalar_select %p2296_p12, 1, 0 }
  0x1c   : > { %s4456_s6 = scalar_select %p2300_p13, 1, 0 }
  0x1d   : > { %4455 = sst [smem:[#allocation18_spill]] %s4454_s5  ;;  %p1803_p1 = scmp.ge.s32.totalorder %s2172_s22, 1 }
  0x1e   : > { %4457 = sst [smem:[#allocation19_spill]] %s4456_s6  ;;  %p144_p6 = scmp.lt.s32.totalorder %s2172_s22, 7 }
  0x1f   : > { %s4458_s1 = sld [smem:[#allocation53_spill]]  ;;  %p1853_p7 = scmp.lt.s32.totalorder %s2172_s22, 6 }
  0x20   : > { %p2309_p5 = pnand %p1803_p1, %p144_p6 }
  0x21   : > { %p2320_p8 = pnand %p1853_p7, %p2274_p4 }
  0x22   : > { %s4459_s10 = scalar_select %p2309_p5, 1, 0 }
  0x23   : > { %p1837_p0 = pneg %p2309_p5 }
  0x25   : > { %s157_s9 = sshll.u32 %s4458_s1, 4  ;;  %p1838_p2 = pnand %p1837_p0, %p2269_p3  ;;  %s158_s9 = int_to_ptr.vmem [resolvable:$true] %s157_s9 }
  0x26   : > { %s1969_s23 = scalar_lea.vmem %s158_s9, 16  ;;  %p1977_p1 = scmp.lt.s32.totalorder %s158_s9, %s158_s9 }
  0x27   : > { %p1970_p9 = scmp.ne.s32.totalorder %s158_s9, %s1969_s23  ;;  %p1971_p13 = pneg %p1838_p2 }
  0x28   : > { %p1978_p11 = scmp.lt.s32.totalorder %s1969_s23, %s1969_s23 }
  0x29   : > { %p1972_p12 = pnand %p1971_p13, %p1970_p9 }
  0x2a   : > { %p1979_p10 = por %p1978_p11, %p1977_p1 }
  0x2b   : > { %p1973_p6 = pneg %p1972_p12 }
  0x2d   : > { %p1980_p5 = pnand %p1979_p10, %p1973_p6 }
  0x2f   : > { %1983 = shalt.err (!%p1980_p5)
}
  0x30   : > { %s2174_s24 = smov [#allocation6]   ;;  %s33_s28 = sadd.s32 1, %s2164_s20 }
  0x31   : > { %1840 = dma.vmem_to_smem (!%p1838_p2), %s158_s9, 16, %s2174_s24, [#allocation5]  }
  0x32   : > { %s36_s7 = sadd.s32 1, %s2168_s21  ;;  %p34_p4 = scmp.ge.s32.totalorder %s33_s28, 3 }
  0x33   : > { %s168_s8 = sand.u32 1, %s2152_s17   ;;  %s1807_s27 = sshll.u32 %s2164_s20, 4 }
  0x34   : > { %s1806_s25 = sshll.u32 %s168_s8, 7  ;;  %s4641_s28 = smov (%p34_p4, %s33_s28), 0 }
  0x35   : > { %4461 = sst [smem:[#allocation20_spill]] %s4641_s28  ;;  %s4643_s7 = smov (!%p34_p4, %s36_s7), %s2168_s21 }
  0x36   : > { %s41_s23 = ssub.s32 %s2164_s20, %s4641_s28  ;;  %p38_p10 = scmp.ge.s32.totalorder %s4643_s7, 2 }
  0x37   : > { %s1825_s1 = smul.u32 48, %s2168_s21  ;;  %s172_s6 = scalar_lea.vmem [#allocation2], %s1806_s25 }
  0x38   : > { %s181_s9 = sshll.u32 %s172_s6, 4  ;;  %s4645_s7 = smov (%p38_p10, %s4643_s7), 0  ;;  %s2336_s9 = int_to_ptr.vmem [resolvable:$true] %s181_s9 }
  0x39   : > { %4462 = sst [smem:[#allocation21_spill]] %s4645_s7  ;;  %s178_s24 = sadd.s32 %s1825_s1, %s1807_s27 }
  0x3a   : > { %s40_s15 = ssub.s32 %s2168_s21, %s4645_s7  ;;  %s1808_s5 = sshll.u32 %s178_s24, 7 }
  0x3b   : > { %s42_s12 = sor.u32 %s41_s23, %s40_s15  ;;  %p90_p11 = scmp.eq.s32.totalorder %s40_s15, 0 }
  0x3c   : > { %p43_p12 = scmp.eq.s32.totalorder %s42_s12, 0  ;;  %s2343_s20 = scalar_lea.hbm %s4387_s0, %s1808_s5 }
  0x3d   : > { %s4463_s25 = sadd.s32 1, %s2140_s14  ;;  %s4464_s1 = sadd.s32 1, %s2152_s17 }
  0x3e   : > { %s2348_s6 = scalar_select %p90_p11, %s2140_s14, %s4463_s25  }
  0x3f   : > { %s2353_s27 = scalar_select %p43_p12, %s2152_s17, %s4464_s1  }
  0x40   : > { %s2355_s7 = scalar_lea.sflag [#allocation3], %s168_s8  ;;  %s1984_s23 = scalar_lea.hbm %s2343_s20, 2048 }
  0x41   : > { %p1985_p13 = scmp.ne.s32.totalorder %s2343_s20, %s1984_s23  ;;  %p1986_p5 = pneg %p2320_p8 }
  0x42   : > { %s1989_s22 = scalar_lea.hbm %s4387_s0, 12288  ;;  %p1990_p2 = scmp.lt.u32.totalorder %s2343_s20, %s4387_s0 }
  0x43   : > { %p1987_p0 = pnand %p1986_p5, %p1985_p13  ;;  %p1991_p9 = scmp.lt.u32.totalorder %s1989_s22, %s1984_s23 }
  0x44   : > { %p1993_p1 = scmp.lt.u32.totalorder %s1984_s23, %s2343_s20 }
  0x45   : > { %p1988_p7 = pneg %p1987_p0  ;;  %p1992_p6 = por %p1991_p9, %p1990_p2 }
  0x47   : > { %p1994_p4 = por %p1993_p1, %p1992_p6 }
  0x49   : > { %p1995_p10 = pnand %p1994_p4, %p1988_p7 }
  0x4b   : > { %1998 = shalt.err (!%p1995_p10)
}
  0x4c   : > { %s1999_s8 = scalar_lea.vmem %s2336_s9, 2048  ;;  %s2175_s24 = smov [#allocation2]  }
  0x4d   : > { %p2000_p11 = scmp.ne.s32.totalorder %s2336_s9, %s1999_s8  ;;  %s2004_s25 = sshll.u32 %s2175_s24, 4  ;;  %s2005_s25 = int_to_ptr.vmem [resolvable:$false] %s2004_s25 }
  0x4e   : > { %s2006_s1 = scalar_lea.vmem %s2005_s25, 4096  ;;  %p2007_p0 = scmp.lt.s32.totalorder %s2336_s9, %s2005_s25 }
  0x4f   : > { %p2002_p12 = pnand %p2000_p11, %p1986_p5  ;;  %p2008_p2 = scmp.lt.s32.totalorder %s2006_s1, %s1999_s8 }
  0x51   : > { %p2003_p13 = pneg %p2002_p12  ;;  %p2009_p9 = por %p2008_p2, %p2007_p0 }
  0x53   : > { %p2010_p6 = pnand %p2009_p9, %p2003_p13 }
  0x55   : > { %2013 = shalt.err (!%p2010_p6)
}
  0x56   : > { %s2176_s23 = smov 128   ;;  %s2177_s12 = smov 8  }
  0x57   : > { %1844 = dma.hbm_to_vmem [thread:$0]  (!%p2320_p8), %s2343_s20, 2048, %s2336_s9, %s2355_s7, %s2176_s23, %s2176_s23, %s2177_s12  }
  0x58   : > { %p4465_p5 = scmp.ne.s32.totalorder %s4459_s10, 0 }
  0x5a   : > { %193 = sbr.rel (%p4465_p5) target bundleno = 747 (0x2eb), region = 28 }
  0x61   : > { %s2386_s15 = sand.u32 1, %s2148_s16   ;;  %p4466_p7 = scmp.ne.s32.totalorder %s4451_s29, 0 }
  0x62   : > { %s1810_s22 = sshll.u32 %s2386_s15, 7  ;;  %s196_s5 = scalar_lea.sflag [#allocation3], %s2386_s15 }
  0x63   : > { %s2392_s28 = scalar_lea.vmem [#allocation2], %s1810_s22 }
  0x64   : > { %2115 = dma.done.wait (%p4466_p7), %s196_s5, 2048  }
  0x65   : > { %2117 = vsyncadd (%p4466_p7), %s196_s5, 4294965248 }
  0x66   : > { %2119 = dma.done.wait (%p2269_p3), [#allocation5], 16  }
  0x67   : > { %2121 = vsyncadd (%p2269_p3), [#allocation5], 4294967280 }
  0x68   : > { %208 = sfence }
  0x69   : > { %v2403_v0 = vld [vmem:[%s2392_s28 + $0x8] sm:$0xff]  ;;  %v234_v1 = vld [vmem:[%s2392_s28 + $0x10] sm:$0xff]  ;;  %v2407_v2 = vld [vmem:[%s2392_s28 + $0x18] sm:$0xff]  ;;  %v248_v3 = vlaneseq  ;;  %s2178_s20 = smov 1   ;;  %s2179_s26 = smov 127  }
  0x6a   : > { %v353_v4 = vrot.slane %v2403_v0, 7  ;;  %v354_v5 = vrot.slane %v234_v1, 7  ;;  %v387_v6 = vrot.slane %v234_v1, 1  ;;  %v388_v7 = vrot.slane %v2407_v2, 1  ;;  %v2412_v8 = vld [vmem:[%s2392_s28] sm:$0xff]  ;;  %v2456_v38 = vld [vmem:[%s2392_s28 + $0x28] sm:$0xff] }
  0x6b   : > { %v2415_v9 = vshrl.u32 %v248_v3, 7  ;;  %v419_v10 = vrot.slane %v2403_v0, 6  ;;  %v420_v11 = vrot.slane %v234_v1, 6  ;;  %v453_v12 = vrot.slane %v234_v1, 2  ;;  %v236_v21 = vld [vmem:[%s2392_s28 + $0x20] sm:$0xff]  ;;  %v238_v59 = vld [vmem:[%s2392_s28 + $0x30] sm:$0xff] }
  0x6c   : > { %v454_v13 = vrot.slane %v2407_v2, 2  ;;  %v614_v14 = vmul.f32 0.375, %v234_v1  ;;  %v352_v15 = vrot.slane %v2412_v8, 7  ;;  %v386_v16 = vrot.slane %v2403_v0, 1  ;;  %s2180_s29 = smov 2   ;;  %s2181_s10 = smov 126  }
  0x6d   : > { %4467 = vst [vmem:[#allocation22_spill] sm:$0xff] %v2415_v9  ;;  %vm368_vm0 = vcmp.lt.s32.totalorder %v2415_v9, 1  ;;  %vm401_vm1 = vcmp.lt.s32.totalorder %v2415_v9, 7  ;;  %vm434_vm2 = vcmp.lt.s32.totalorder %v2415_v9, 2  ;;  %vm467_vm3 = vcmp.lt.s32.totalorder %v2415_v9, 6  ;;  %s222_s11 = sand.u32 1, %s2136_s13  }
  0x6e   : > { %v382_v17 = vsel %vm368_vm0, %v353_v4, %v354_v5  ;;  %v414_v18 = vsel %vm401_vm1, %v387_v6, %v388_v7  ;;  %v448_v19 = vsel %vm434_vm2, %v419_v10, %v420_v11  ;;  %v480_v20 = vsel %vm467_vm3, %v453_v12, %v454_v13  ;;  %s3348_s7 = sshll.u32 %s222_s11, 7  ;;  %s1540_s9 = sld [smem:[#allocation6 + %s2156_s18]] }
  0x6f   : > { %v534_v22 = vadd.f32 %v480_v20, %v448_v19  ;;  %v566_v23 = vadd.f32 %v414_v18, %v382_v17  ;;  %v383_v24 = vsel %vm368_vm0, %v352_v15, %v353_v4  ;;  %v415_v25 = vsel %vm401_vm1, %v386_v16, %v387_v6  ;;  %v2492_v18 = vld [vmem:[%s2392_s28 + $0x38] sm:$0xff]  ;;  %s3661_s8 = scalar_lea.vmem [#allocation8], %s1810_s22  ;;  %s4192_s24 = scalar_lea.vmem [#allocation7], %s3348_s7 }
  0x70   : > { %v418_v26 = vrot.slane %v2412_v8, 6  ;;  %v452_v27 = vrot.slane %v2403_v0, 2  ;;  %v565_v28 = vadd.f32 %v415_v25, %v383_v24  ;;  %v613_v29 = vmul.f32 0.375, %v2403_v0  ;;  %p1814_p3 = scmp.ne.s32.totalorder %s2156_s18, 0 }
  0x71   : > { %v550_v30 = vmul.f32 0.0625, %v534_v22  ;;  %v582_v31 = vmul.f32 0.25, %v566_v23  ;;  %v355_v32 = vrot.slane %v2407_v2, 7  ;;  %v389_v33 = vrot.slane %v236_v21, 1 }
  0x72   : > { %v449_v34 = vsel %vm434_vm2, %v418_v26, %v419_v10  ;;  %v481_v35 = vsel %vm467_vm3, %v452_v27, %v453_v12  ;;  %v581_v36 = vmul.f32 0.25, %v565_v28  ;;  %v421_v37 = vrot.slane %v2407_v2, 6 }
  0x73   : > { %v598_v39 = vadd.f32 %v582_v31, %v550_v30  ;;  %v533_v40 = vadd.f32 %v481_v35, %v449_v34  ;;  %v381_v41 = vsel %vm368_vm0, %v354_v5, %v355_v32  ;;  %v413_v42 = vsel %vm401_vm1, %v388_v7, %v389_v33 }
  0x74   : > { %v447_v43 = vsel %vm434_vm2, %v420_v11, %v421_v37  ;;  %v455_v44 = vrot.slane %v236_v21, 2  ;;  %v567_v45 = vadd.f32 %v413_v42, %v381_v41  ;;  %v615_v46 = vmul.f32 0.375, %v2407_v2 }
  0x75   : > { %v2465_v47 = vadd.f32 %v614_v14, %v598_v39  ;;  %v549_v48 = vmul.f32 0.0625, %v533_v40  ;;  %v356_v49 = vrot.slane %v236_v21, 7  ;;  %v390_v50 = vrot.slane %v2456_v38, 1 }
  0x76   : > { %v479_v51 = vsel %vm467_vm3, %v454_v13, %v455_v44  ;;  %v583_v52 = vmul.f32 0.25, %v567_v45  ;;  %v422_v53 = vrot.slane %v236_v21, 6  ;;  %v456_v54 = vrot.slane %v2456_v38, 2 }
  0x77   : > { %648 = vrot.lane.b32.xlu1 %v2465_v47, %s2178_s20  ;;  %v597_v55 = vadd.f32 %v581_v36, %v549_v48  ;;  %v535_v56 = vadd.f32 %v479_v51, %v447_v43  ;;  %v380_v57 = vsel %vm368_vm0, %v355_v32, %v356_v49  ;;  %v412_v58 = vsel %vm401_vm1, %v389_v33, %v390_v50  ;;  %v2507_v33 = vld [vmem:[%s2392_s28 + $0x40] sm:$0xff]  ;;  %v2529_v51 = vld [vmem:[%s2392_s28 + $0x78] sm:$0xff] }
  0x78   : > { %v446_v60 = vsel %vm434_vm2, %v421_v37, %v422_v53  ;;  %v478_v61 = vsel %vm467_vm3, %v455_v44, %v456_v54  ;;  %v568_v62 = vadd.f32 %v412_v58, %v380_v57  ;;  %v616_v63 = vmul.f32 0.375, %v236_v21 }
  0x79   : > { %v2482_v1 = vadd.f32 %v613_v29, %v597_v55  ;;  %v551_v2 = vmul.f32 0.0625, %v535_v56  ;;  %v536_v4 = vadd.f32 %v478_v61, %v446_v60  ;;  %v357_v5 = vrot.slane %v2456_v38, 7 }
  0x7a   : > { %v584_v6 = vmul.f32 0.25, %v568_v62  ;;  %v391_v7 = vrot.slane %v238_v59, 1  ;;  %v423_v10 = vrot.slane %v2456_v38, 6  ;;  %v457_v11 = vrot.slane %v238_v59, 2 }
  0x7b   : > { %646 = vrot.lane.b32.xlu0 %v2482_v1, %s2178_s20  ;;  %v599_v12 = vadd.f32 %v583_v52, %v551_v2  ;;  %v552_v13 = vmul.f32 0.0625, %v536_v4  ;;  %v379_v14 = vsel %vm368_vm0, %v356_v49, %v357_v5  ;;  %v617_v17 = vmul.f32 0.375, %v2456_v38 }
  0x7c   : > { %v411_v19 = vsel %vm401_vm1, %v390_v50, %v391_v7  ;;  %v445_v20 = vsel %vm434_vm2, %v422_v53, %v423_v10  ;;  %v477_v21 = vsel %vm467_vm3, %v456_v54, %v457_v11  ;;  %v358_v22 = vrot.slane %v238_v59, 7 }
  0x7d   : > { %v2500_v23 = vadd.f32 %v615_v46, %v599_v12  ;;  %v600_v24 = vadd.f32 %v584_v6, %v552_v13  ;;  %v537_v25 = vadd.f32 %v477_v21, %v445_v20  ;;  %v569_v28 = vadd.f32 %v411_v19, %v379_v14  ;;  %v2548_v6 = vld [vmem:[%s2392_s28 + $0x48] sm:$0xff]  ;;  %v2565_v13 = vld [vmem:[%s2392_s28 + $0x50] sm:$0xff] }
  0x7e   : > { %v378_v29 = vsel %vm368_vm0, %v357_v5, %v358_v22  ;;  %v392_v30 = vrot.slane %v2492_v18, 1  ;;  %v424_v31 = vrot.slane %v238_v59, 6  ;;  %v458_v32 = vrot.slane %v2492_v18, 2 }
  0x7f   : > { %650 = vrot.lane.b32.xlu1 %v2500_v23, %s2178_s20  ;;  %v2511_v34 = vadd.f32 %v616_v63, %v600_v24  ;;  %v553_v35 = vmul.f32 0.0625, %v537_v25  ;;  %v585_v36 = vmul.f32 0.25, %v569_v28  ;;  %v618_v37 = vmul.f32 0.375, %v238_v59 }
  0x80   : > { %v410_v38 = vsel %vm401_vm1, %v391_v7, %v392_v30  ;;  %v444_v39 = vsel %vm434_vm2, %v423_v10, %v424_v31  ;;  %v476_v40 = vsel %vm467_vm3, %v457_v11, %v458_v32  ;;  %v359_v41 = vrot.slane %v2492_v18, 7 }
  0x81   : > { %652 = vrot.lane.b32.xlu0 %v2511_v34, %s2178_s20  ;;  %v601_v42 = vadd.f32 %v585_v36, %v553_v35  ;;  %v538_v43 = vadd.f32 %v476_v40, %v444_v39  ;;  %v570_v44 = vadd.f32 %v410_v38, %v378_v29  ;;  %v393_v45 = vrot.slane %v2507_v33, 1 }
  0x82   : > { %v377_v46 = vsel %vm368_vm0, %v358_v22, %v359_v41  ;;  %v425_v48 = vrot.slane %v2492_v18, 6  ;;  %v459_v49 = vrot.slane %v2507_v33, 2  ;;  %v619_v50 = vmul.f32 0.375, %v2492_v18 }
  0x83   : > { %v2531_v52 = vadd.f32 %v617_v17, %v601_v42  ;;  %v554_v53 = vmul.f32 0.0625, %v538_v43  ;;  %v586_v54 = vmul.f32 0.25, %v570_v44  ;;  %v409_v55 = vsel %vm401_vm1, %v392_v30, %v393_v45 }
  0x84   : > { %v443_v56 = vsel %vm434_vm2, %v424_v31, %v425_v48  ;;  %v475_v57 = vsel %vm467_vm3, %v458_v32, %v459_v49  ;;  %v571_v58 = vadd.f32 %v409_v55, %v377_v46  ;;  %vm267_vm4 = vcmp.eq.s32.totalorder %v2415_v9, 0  ;;  %v2613_v46 = vld [vmem:[%s2392_s28 + $0x58] sm:$0xff] }
  0x85   : > { %654 = vrot.lane.b32.xlu1 %v2531_v52, %s2178_s20  ;;  %v602_v59 = vadd.f32 %v586_v54, %v554_v53  ;;  %v539_v60 = vadd.f32 %v475_v57, %v443_v56  ;;  %v367_v61 = vrot.slane %v2529_v51, 7  ;;  %v385_v62 = vrot.slane %v2412_v8, 1  ;;  %v2618_v56 = vld [vmem:[%s2392_s28 + $0x60] sm:$0xff] }
  0x86   : > { %v587_v63 = vmul.f32 0.25, %v571_v58  ;;  %v433_v2 = vrot.slane %v2529_v51, 6  ;;  %v451_v4 = vrot.slane %v2412_v8, 2  ;;  %v612_v5 = vmul.f32 0.375, %v2412_v8 }
  0x87   : > { %v2550_v7 = vadd.f32 %v618_v37, %v602_v59  ;;  %v555_v10 = vmul.f32 0.0625, %v539_v60  ;;  %v384_v11 = vsel %vm368_vm0, %v367_v61, %v352_v15  ;;  %v416_v12 = vsel %vm401_vm1, %v385_v62, %v386_v16 }
  0x88   : > { %v450_v14 = vsel %vm434_vm2, %v433_v2, %v418_v26  ;;  %v482_v15 = vsel %vm467_vm3, %v451_v4, %v452_v27  ;;  %v484_v17 = vsel %vm267_vm4, %v416_v12, %v384_v11  ;;  %v360_v16 = vrot.slane %v2507_v33, 7 }
  0x89   : > { %656 = vrot.lane.b32.xlu0 %v2550_v7, %s2178_s20  ;;  %v603_v18 = vadd.f32 %v587_v63, %v555_v10  ;;  %v500_v19 = vsel %vm267_vm4, %v482_v15, %v450_v14  ;;  %v564_v26 = vadd.f32 %v484_v17, %v416_v12  ;;  %v361_v0 = vrot.slane %v2548_v6, 7 }
  0x8a   : > { %v532_v20 = vadd.f32 %v500_v19, %v482_v15  ;;  %v394_v21 = vrot.slane %v2548_v6, 1  ;;  %v395_v27 = vrot.slane %v2565_v13, 1  ;;  %v426_v22 = vrot.slane %v2507_v33, 6 }
  0x8b   : > { %v2590_v24 = vadd.f32 %v619_v50, %v603_v18  ;;  %v580_v25 = vmul.f32 0.25, %v564_v26  ;;  %v375_v28 = vsel %vm368_vm0, %v360_v16, %v361_v0  ;;  %v427_v29 = vrot.slane %v2548_v6, 6 }
  0x8c   : > { %v548_v30 = vmul.f32 0.0625, %v532_v20  ;;  %v407_v31 = vsel %vm401_vm1, %v394_v21, %v395_v27  ;;  %v460_v32 = vrot.slane %v2548_v6, 2  ;;  %v461_v35 = vrot.slane %v2565_v13, 2 }
  0x8d   : > { %658 = vrot.lane.b32.xlu1 %v2590_v24, %s2178_s20  ;;  %v441_v36 = vsel %vm434_vm2, %v426_v22, %v427_v29  ;;  %v573_v37 = vadd.f32 %v407_v31, %v375_v28  ;;  %v621_v38 = vmul.f32 0.375, %v2548_v6  ;;  %v376_v39 = vsel %vm368_vm0, %v359_v41, %v360_v16 }
  0x8e   : > { %v596_v40 = vadd.f32 %v580_v25, %v548_v30  ;;  %v473_v42 = vsel %vm467_vm3, %v460_v32, %v461_v35  ;;  %v408_v43 = vsel %vm401_vm1, %v393_v45, %v394_v21  ;;  %v442_v44 = vsel %vm434_vm2, %v425_v48, %v426_v22  ;;  %v2647_v22 = vld [vmem:[%s2392_s28 + $0x68] sm:$0xff] }
  0x8f   : > { %v541_v50 = vadd.f32 %v473_v42, %v441_v36  ;;  %v589_v53 = vmul.f32 0.25, %v573_v37  ;;  %v474_v54 = vsel %vm467_vm3, %v459_v49, %v460_v32  ;;  %v572_v55 = vadd.f32 %v408_v43, %v376_v39  ;;  %v2656_v32 = vld [vmem:[%s2392_s28 + $0x70] sm:$0xff] }
  0x90   : > { %v2620_v41 = vadd.f32 %v612_v5, %v596_v40  ;;  %v540_v57 = vadd.f32 %v474_v54, %v442_v44  ;;  %v620_v58 = vmul.f32 0.375, %v2507_v33  ;;  %v362_v45 = vrot.slane %v2565_v13, 7 }
  0x91   : > { %v557_v59 = vmul.f32 0.0625, %v541_v50  ;;  %v588_v60 = vmul.f32 0.25, %v572_v55  ;;  %v363_v48 = vrot.slane %v2613_v46, 7  ;;  %v396_v63 = vrot.slane %v2613_v46, 1 }
  0x92   : > { %644 = vrot.lane.b32.xlu0 %v2620_v41, %s2178_s20  ;;  %v556_v49 = vmul.f32 0.0625, %v540_v57  ;;  %v397_v6 = vrot.slane %v2618_v56, 1  ;;  %v428_v5 = vrot.slane %v2565_v13, 6  ;;  %v429_v10 = vrot.slane %v2613_v46, 6 }
  0x93   : > { %v605_v33 = vadd.f32 %v589_v53, %v557_v59  ;;  %v373_v11 = vsel %vm368_vm0, %v362_v45, %v363_v48  ;;  %v462_v12 = vrot.slane %v2613_v46, 2  ;;  %v463_v14 = vrot.slane %v2618_v56, 2 }
  0x94   : > { %v604_v15 = vadd.f32 %v588_v60, %v556_v49  ;;  %v405_v17 = vsel %vm401_vm1, %v396_v63, %v397_v6  ;;  %v439_v16 = vsel %vm434_vm2, %v428_v5, %v429_v10  ;;  %v623_v18 = vmul.f32 0.375, %v2613_v46 }
  0x95   : > { %v2640_v19 = vadd.f32 %v621_v38, %v605_v33  ;;  %v471_v26 = vsel %vm467_vm3, %v462_v12, %v463_v14  ;;  %v575_v20 = vadd.f32 %v405_v17, %v373_v11  ;;  %v374_v21 = vsel %vm368_vm0, %v361_v0, %v362_v45 }
  0x96   : > { %v2649_v25 = vadd.f32 %v620_v58, %v604_v15  ;;  %v543_v28 = vadd.f32 %v471_v26, %v439_v16  ;;  %v406_v30 = vsel %vm401_vm1, %v395_v27, %v396_v63  ;;  %v440_v31 = vsel %vm434_vm2, %v427_v29, %v428_v5 }
  0x97   : > { %662 = vrot.lane.b32.xlu1 %v2640_v19, %s2178_s20  ;;  %v591_v36 = vmul.f32 0.25, %v575_v20  ;;  %v472_v0 = vsel %vm467_vm3, %v461_v35, %v462_v12  ;;  %v574_v37 = vadd.f32 %v406_v30, %v374_v21  ;;  %v622_v38 = vmul.f32 0.375, %v2565_v13 }
  0x98   : > { %660 = vrot.lane.b32.xlu0 %v2649_v25, %s2178_s20  ;;  %v559_v39 = vmul.f32 0.0625, %v543_v28  ;;  %v542_v27 = vadd.f32 %v472_v0, %v440_v31  ;;  %v364_v40 = vrot.slane %v2618_v56, 7  ;;  %v365_v29 = vrot.slane %v2647_v22, 7 }
  0x99   : > { %v590_v42 = vmul.f32 0.25, %v574_v37  ;;  %v398_v43 = vrot.slane %v2647_v22, 1  ;;  %v399_v44 = vrot.slane %v2656_v32, 1  ;;  %v430_v46 = vrot.slane %v2618_v56, 6 }
  0x9a   : > { %v607_v35 = vadd.f32 %v591_v36, %v559_v39  ;;  %v558_v50 = vmul.f32 0.0625, %v542_v27  ;;  %v371_v13 = vsel %vm368_vm0, %v364_v40, %v365_v29  ;;  %v431_v53 = vrot.slane %v2647_v22, 6 }
  0x9b   : > { %v403_v54 = vsel %vm401_vm1, %v398_v43, %v399_v44  ;;  %v464_v55 = vrot.slane %v2647_v22, 2  ;;  %v465_v57 = vrot.slane %v2656_v32, 2  ;;  %v625_v58 = vmul.f32 0.375, %v2647_v22 }
  0x9c   : > { %v2678_v45 = vadd.f32 %v623_v18, %v607_v35  ;;  %v606_v59 = vadd.f32 %v590_v42, %v558_v50  ;;  %v437_v60 = vsel %vm434_vm2, %v430_v46, %v431_v53  ;;  %v577_v63 = vadd.f32 %v403_v54, %v371_v13 }
  0x9d   : > { %v469_v49 = vsel %vm467_vm3, %v464_v55, %v465_v57  ;;  %v372_v5 = vsel %vm368_vm0, %v363_v48, %v364_v40  ;;  %v404_v33 = vsel %vm401_vm1, %v397_v6, %v398_v43  ;;  %v438_v11 = vsel %vm434_vm2, %v429_v10, %v430_v46 }
  0x9e   : > { %666 = vrot.lane.b32.xlu1 %v2678_v45, %s2178_s20  ;;  %v2692_v12 = vadd.f32 %v622_v38, %v606_v59  ;;  %v545_v15 = vadd.f32 %v469_v49, %v437_v60  ;;  %v593_v17 = vmul.f32 0.25, %v577_v63  ;;  %v470_v16 = vsel %vm467_vm3, %v463_v14, %v464_v55 }
  0x9f   : > { %v544_v18 = vadd.f32 %v470_v16, %v438_v11  ;;  %v576_v26 = vadd.f32 %v404_v33, %v372_v5  ;;  %v624_v48 = vmul.f32 0.375, %v2618_v56  ;;  %v2698_v20 = vadd.s32 120, %v2415_v9 }
  0xa0   : > { %664 = vrot.lane.b32.xlu0 %v2692_v12, %s2178_s20  ;;  %v561_v6 = vmul.f32 0.0625, %v545_v15  ;;  %v366_v10 = vrot.slane %v2656_v32, 7  ;;  %v400_v21 = vrot.slane %v2529_v51, 1  ;;  %v432_v22 = vrot.slane %v2656_v32, 6 }
  0xa1   : > { %4468 = vst [vmem:[#allocation23_spill] sm:$0xff] %v2698_v20  ;;  %v560_v28 = vmul.f32 0.0625, %v544_v18  ;;  %v592_v30 = vmul.f32 0.25, %v576_v26  ;;  %vm298_vm5 = vcmp.eq.s32.totalorder %v2698_v20, 126  ;;  %v466_v14 = vrot.slane %v2529_v51, 2 }
  0xa2   : > { %v609_v56 = vadd.f32 %v593_v17, %v561_v6  ;;  %v369_v31 = vsel %vm368_vm0, %v366_v10, %v367_v61  ;;  %v417_v36 = vsel %vm401_vm1, %v400_v21, %v385_v62  ;;  %v435_v0 = vsel %vm434_vm2, %v432_v22, %v433_v2 }
  0xa3   : > { %v608_v37 = vadd.f32 %v592_v30, %v560_v28  ;;  %v483_v38 = vsel %vm467_vm3, %v466_v14, %v451_v4  ;;  %v579_v39 = vadd.f32 %v417_v36, %v369_v31  ;;  %v370_v62 = vsel %vm368_vm0, %v365_v29, %v366_v10 }
  0xa4   : > { %v2723_v27 = vadd.f32 %v625_v58, %v609_v56  ;;  %v531_v61 = vsel %vm298_vm5, %v2529_v51, %v483_v38  ;;  %v402_v40 = vsel %vm401_vm1, %v399_v44, %v400_v21  ;;  %v436_v4 = vsel %vm434_vm2, %v431_v53, %v432_v22 }
  0xa5   : > { %v2732_v2 = vadd.f32 %v624_v48, %v608_v37  ;;  %v547_v42 = vadd.f32 %v531_v61, %v435_v0  ;;  %v595_v8 = vmul.f32 0.25, %v579_v39  ;;  %v468_v43 = vsel %vm467_vm3, %v465_v57, %v466_v14 }
  0xa6   : > { %4469 = vst [vmem:[#allocation24_spill] sm:$0xff] %v2723_v27  ;;  %670 = vrot.lane.b32.xlu1 %v2723_v27, %s2178_s20  ;;  %v578_v46 = vadd.f32 %v402_v40, %v370_v62  ;;  %v627_v44 = vmul.f32 0.375, %v2529_v51  ;;  %v546_v35 = vadd.f32 %v468_v43, %v436_v4  ;;  %v626_v55 = vmul.f32 0.375, %v2656_v32 }
  0xa7   : > { %4470 = vst [vmem:[#allocation25_spill] sm:$0xff] %v2732_v2  ;;  %668 = vrot.lane.b32.xlu0 %v2732_v2, %s2178_s20  ;;  %v563_v29 = vmul.f32 0.0625, %v547_v42 }
  0xa8   : > { %v594_v50 = vmul.f32 0.25, %v578_v46  ;;  %v562_v54 = vmul.f32 0.0625, %v546_v35 }
  0xa9   : > { %v611_v13 = vadd.f32 %v595_v8, %v563_v29 }
  0xaa   : > { %v610_v58 = vadd.f32 %v594_v50, %v562_v54 }
  0xab   : > { %v2744_v53 = vadd.f32 %v627_v44, %v611_v13 }
  0xac   : > { %v2748_v57 = vadd.f32 %v626_v55, %v610_v58  ;;  %v2909_v55 = vand.u32 127, %v248_v3 }
  0xad   : > { %4471 = vst [vmem:[#allocation26_spill] sm:$0xff] %v2744_v53  ;;  %674 = vrot.lane.b32.xlu1 %v2744_v53, %s2178_s20 }
  0xae   : > { %4472 = vst [vmem:[#allocation27_spill] sm:$0xff] %v2748_v57  ;;  %672 = vrot.lane.b32.xlu0 %v2748_v57, %s2178_s20  ;;  %vm347_vm6 = vcmp.eq.s32.totalorder %v2909_v55, 0  ;;  %vm348_vm7 = vcmp.eq.s32.totalorder %v2909_v55, 126  ;;  %vm349_vm8 = vcmp.eq.s32.totalorder %v2909_v55, 127 }
  0xb1   : > { %678 = vrot.lane.b32.xlu1 %v2482_v1, %s2179_s26 }
  0xb2   : > { %676 = vrot.lane.b32.xlu0 %v2620_v41, %s2179_s26 }
  0xb5   : > { %682 = vrot.lane.b32.xlu1 %v2500_v23, %s2179_s26 }
  0xb6   : > { %680 = vrot.lane.b32.xlu0 %v2465_v47, %s2179_s26 }
  0xb9   : > { %686 = vrot.lane.b32.xlu1 %v2531_v52, %s2179_s26 }
  0xba   : > { %684 = vrot.lane.b32.xlu0 %v2511_v34, %s2179_s26 }
  0xbd   : > { %690 = vrot.lane.b32.xlu1 %v2590_v24, %s2179_s26 }
  0xbe   : > { %688 = vrot.lane.b32.xlu0 %v2550_v7, %s2179_s26 }
  0xc1   : > { %694 = vrot.lane.b32.xlu1 %v2640_v19, %s2179_s26 }
  0xc2   : > { %692 = vrot.lane.b32.xlu0 %v2649_v25, %s2179_s26 }
  0xc5   : > { %698 = vrot.lane.b32.xlu1 %v2678_v45, %s2179_s26 }
  0xc6   : > { %696 = vrot.lane.b32.xlu0 %v2692_v12, %s2179_s26 }
  0xc9   : > { %702 = vrot.lane.b32.xlu1 %v2723_v27, %s2179_s26 }
  0xca   : > { %700 = vrot.lane.b32.xlu0 %v2732_v2, %s2179_s26 }
  0xcd   : > { %706 = vrot.lane.b32.xlu1 %v2744_v53, %s2179_s26 }
  0xce   : > { %704 = vrot.lane.b32.xlu0 %v2748_v57, %s2179_s26 }
  0xd1   : > { %710 = vrot.lane.b32.xlu1 %v2482_v1, %s2180_s29 }
  0xd2   : > { %708 = vrot.lane.b32.xlu0 %v2620_v41, %s2180_s29 }
  0xd5   : > { %714 = vrot.lane.b32.xlu1 %v2500_v23, %s2180_s29 }
  0xd6   : > { %712 = vrot.lane.b32.xlu0 %v2465_v47, %s2180_s29 }
  0xd9   : > { %718 = vrot.lane.b32.xlu1 %v2531_v52, %s2180_s29 }
  0xda   : > { %716 = vrot.lane.b32.xlu0 %v2511_v34, %s2180_s29 }
  0xdd   : > { %722 = vrot.lane.b32.xlu1 %v2590_v24, %s2180_s29 }
  0xde   : > { %720 = vrot.lane.b32.xlu0 %v2550_v7, %s2180_s29 }
  0xe1   : > { %726 = vrot.lane.b32.xlu1 %v2640_v19, %s2180_s29 }
  0xe2   : > { %724 = vrot.lane.b32.xlu0 %v2649_v25, %s2180_s29 }
  0xe5   : > { %730 = vrot.lane.b32.xlu1 %v2678_v45, %s2180_s29 }
  0xe6   : > { %728 = vrot.lane.b32.xlu0 %v2692_v12, %s2180_s29 }
  0xe9   : > { %734 = vrot.lane.b32.xlu1 %v2723_v27, %s2180_s29  ;;  %v2822_v51 = vpop.permute.xlu1 %648 }
  0xea   : > { %732 = vrot.lane.b32.xlu0 %v2732_v2, %s2180_s29 }
  0xed   : > { %738 = vrot.lane.b32.xlu1 %v2744_v53, %s2180_s29  ;;  %v647_v32 = vpop.permute.xlu0 %646 }
  0xee   : > { %736 = vrot.lane.b32.xlu0 %v2748_v57, %s2180_s29 }
  0xf1   : > { %742 = vrot.lane.b32.xlu1 %v2482_v1, %s2181_s10  ;;  %v651_v59 = vpop.permute.xlu1 %650 }
  0xf2   : > { %740 = vrot.lane.b32.xlu0 %v2620_v41, %s2181_s10 }
  0xf3   : > { %v2832_v60 = vpop.permute.xlu0 %652 }
  0xf5   : > { %746 = vrot.lane.b32.xlu1 %v2500_v23, %s2181_s10 }
  0xf6   : > { %744 = vrot.lane.b32.xlu0 %v2465_v47, %s2181_s10 }
  0xf7   : > { %v655_v63 = vpop.permute.xlu1 %654 }
  0xf9   : > { %750 = vrot.lane.b32.xlu1 %v2531_v52, %s2181_s10 }
  0xfa   : > { %748 = vrot.lane.b32.xlu0 %v2511_v34, %s2181_s10 }
  0xfb   : > { %v2840_v49 = vpop.permute.xlu0 %656 }
  0xfd   : > { %770 = vrot.lane.b32.xlu1 %v2744_v53, %s2181_s10 }
  0xfe   : > { %752 = vrot.lane.b32.xlu0 %v2550_v7, %s2181_s10 }
  0xff   : > { %v2846_v5 = vpop.permute.xlu1 %658 }
 0x101   : > { %756 = vrot.lane.b32.xlu1 %v2649_v25, %s2181_s10 }
 0x102   : > { %754 = vrot.lane.b32.xlu0 %v2590_v24, %s2181_s10 }
 0x104   : > { %v645_v33 = vpop.permute.xlu0 %644 }
 0x105   : > { %760 = vrot.lane.b32.xlu1 %v2692_v12, %s2181_s10 }
 0x106   : > { %758 = vrot.lane.b32.xlu0 %v2640_v19, %s2181_s10 }
 0x109   : > { %764 = vrot.lane.b32.xlu1 %v2732_v2, %s2181_s10  ;;  %v2854_v11 = vpop.permute.xlu1 %662 }
 0x10a   : > { %762 = vrot.lane.b32.xlu0 %v2678_v45, %s2181_s10  ;;  %v2858_v15 = vpop.permute.xlu0 %660 }
 0x10d   : > { %768 = vrot.lane.b32.xlu1 %v2748_v57, %s2181_s10 }
 0x10e   : > { %766 = vrot.lane.b32.xlu0 %v2723_v27, %s2181_s10 }
 0x110   : > { %v2860_v17 = vpop.permute.xlu1 %666 }
 0x112   : > { %v2862_v16 = vpop.permute.xlu0 %664 }
 0x118   : > { %v2864_v18 = vpop.permute.xlu1 %670 }
 0x119   : > { %v2866_v26 = vpop.permute.xlu0 %668 }
 0x11f   : > { %v2868_v48 = vpop.permute.xlu1 %674 }
 0x120   : > { %4473 = vst [vmem:[#allocation28_spill] sm:$0xff] %v2868_v48  ;;  %v2870_v6 = vpop.permute.xlu0 %672  ;;  %v903_v48 = vmul.f32 0.375, %v2500_v23 }
 0x121   : > { %4474 = vst [vmem:[#allocation29_spill] sm:$0xff] %v2870_v6  ;;  %v901_v6 = vmul.f32 0.375, %v2482_v1 }
 0x123   : > { %v679_v10 = vpop.permute.xlu1 %678 }
 0x124   : > { %v677_v21 = vpop.permute.xlu0 %676  ;;  %v773_v27 = vsel %vm347_vm6, %v679_v10, %v647_v32  ;;  %v2934_v32 = vmul.f32 0.375, %v2620_v41 }
 0x126   : > { %4483 = vst [vmem:[#allocation38_spill] sm:$0xff] %v2934_v32 }
 0x127   : > { %v683_v22 = vpop.permute.xlu1 %682 }
 0x128   : > { %v681_v28 = vpop.permute.xlu0 %680 }
 0x129   : > { %v774_v3 = vsel %vm347_vm6, %v681_v28, %v2822_v51 }
 0x12a   : > { %v854_v51 = vadd.f32 %v774_v3, %v681_v28  ;;  %v2957_v3 = vmul.f32 0.375, %v2649_v25 }
 0x12b   : > { %v687_v30 = vpop.permute.xlu1 %686 }
 0x12c   : > { %v2872_v14 = vpop.permute.xlu0 %684 }
 0x12f   : > { %v2874_v56 = vpop.permute.xlu1 %690 }
 0x130   : > { %v2876_v31 = vpop.permute.xlu0 %688 }
 0x133   : > { %v2878_v36 = vpop.permute.xlu1 %694 }
 0x134   : > { %v2880_v0 = vpop.permute.xlu0 %692 }
 0x137   : > { %v2882_v37 = vpop.permute.xlu1 %698 }
 0x138   : > { %v2884_v38 = vpop.permute.xlu0 %696 }
 0x13b   : > { %v2886_v39 = vpop.permute.xlu1 %702 }
 0x13c   : > { %v2888_v61 = vpop.permute.xlu0 %700 }
 0x13f   : > { %v2890_v62 = vpop.permute.xlu1 %706 }
 0x140   : > { %4475 = vst [vmem:[#allocation30_spill] sm:$0xff] %v2890_v62  ;;  %v2892_v40 = vpop.permute.xlu0 %704  ;;  %v853_v62 = vadd.f32 %v773_v27, %v679_v10  ;;  %v772_v27 = vsel %vm347_vm6, %v677_v21, %v645_v33 }
 0x141   : > { %4476 = vst [vmem:[#allocation31_spill] sm:$0xff] %v2892_v40  ;;  %v775_v40 = vsel %vm347_vm6, %v683_v22, %v651_v59  ;;  %v2938_v59 = vmul.f32 0.375, %v2465_v47 }
 0x142   : > { %v855_v2 = vadd.f32 %v775_v40, %v683_v22  ;;  %v2954_v40 = vmul.f32 0.375, %v2550_v7  ;;  %v869_v33 = vmul.f32 0.25, %v853_v62  ;;  %v776_v62 = vsel %vm347_vm6, %v2872_v14, %v2832_v60 }
 0x143   : > { %v711_v42 = vpop.permute.xlu1 %710 }
 0x144   : > { %v709_v8 = vpop.permute.xlu0 %708  ;;  %4484 = vst [vmem:[#allocation39_spill] sm:$0xff] %v2954_v40 }
 0x147   : > { %v715_v4 = vpop.permute.xlu1 %714 }
 0x148   : > { %v713_v43 = vpop.permute.xlu0 %712 }
 0x14b   : > { %v2894_v46 = vpop.permute.xlu1 %718 }
 0x14c   : > { %v2896_v29 = vpop.permute.xlu0 %716 }
 0x14f   : > { %v2898_v44 = vpop.permute.xlu1 %722 }
 0x150   : > { %v2900_v35 = vpop.permute.xlu0 %720 }
 0x153   : > { %v2902_v50 = vpop.permute.xlu1 %726 }
 0x154   : > { %4477 = vst [vmem:[#allocation32_spill] sm:$0xff] %v2902_v50  ;;  %v2904_v13 = vpop.permute.xlu0 %724  ;;  %v2960_v50 = vmul.f32 0.375, %v2590_v24 }
 0x157   : > { %v2906_v54 = vpop.permute.xlu1 %730 }
 0x158   : > { %4478 = vst [vmem:[#allocation33_spill] sm:$0xff] %v2906_v54  ;;  %v2911_v58 = vpop.permute.xlu0 %728  ;;  %v777_v54 = vsel %vm347_vm6, %v687_v30, %v655_v63  ;;  %v2941_v63 = vmul.f32 0.375, %v2531_v52 }
 0x159   : > { %v857_v10 = vadd.f32 %v777_v54, %v687_v30  ;;  %v2963_v30 = vmul.f32 0.375, %v2692_v12 }
 0x15b   : > { %v2913_v20 = vpop.permute.xlu1 %734  ;;  %4485 = vst [vmem:[#allocation40_spill] sm:$0xff] %v2963_v30  ;;  %v873_v32 = vmul.f32 0.25, %v857_v10 }
 0x15c   : > { %4479 = vst [vmem:[#allocation34_spill] sm:$0xff] %v2913_v20  ;;  %v2916_v9 = vpop.permute.xlu0 %732 }
 0x15d   : > { %4480 = vst [vmem:[#allocation35_spill] sm:$0xff] %v2916_v9 }
 0x15f   : > { %v2920_v57 = vpop.permute.xlu1 %738 }
 0x160   : > { %4481 = vst [vmem:[#allocation36_spill] sm:$0xff] %v2920_v57  ;;  %v2929_v20 = vpop.permute.xlu0 %736 }
 0x161   : > { %4482 = vst [vmem:[#allocation37_spill] sm:$0xff] %v2929_v20  ;;  %v2944_v20 = vmul.f32 0.375, %v2511_v34 }
 0x163   : > { %v743_v9 = vpop.permute.xlu1 %742 }
 0x164   : > { %v789_v53 = vsel %vm347_vm6, %v743_v9, %v711_v42  ;;  %v805_v57 = vsel %vm348_vm7, %v2482_v1, %v743_v9  ;;  %v741_v28 = vpop.permute.xlu0 %740  ;;  %v2966_v42 = vmul.f32 0.375, %v2640_v19  ;;  %v2969_v9 = vmul.f32 0.375, %v2678_v45 }
 0x165   : > { %v821_v22 = vadd.f32 %v805_v57, %v789_v53  ;;  %v852_v1 = vadd.f32 %v772_v27, %v677_v21  ;;  %v871_v53 = vmul.f32 0.25, %v855_v2  ;;  %v870_v57 = vmul.f32 0.25, %v854_v51 }
 0x166   : > { %4486 = vst [vmem:[#allocation41_spill] sm:$0xff] %v2966_v42  ;;  %v779_v2 = vsel %vm347_vm6, %v2874_v56, %v2846_v5  ;;  %v778_v21 = vsel %vm347_vm6, %v2876_v31, %v2840_v49 }
 0x167   : > { %v837_v54 = vmul.f32 0.0625, %v821_v22  ;;  %v747_v40 = vpop.permute.xlu1 %746  ;;  %v856_v22 = vadd.f32 %v776_v62, %v2872_v14 }
 0x168   : > { %v791_v30 = vsel %vm347_vm6, %v747_v40, %v715_v4  ;;  %v807_v42 = vsel %vm348_vm7, %v2500_v23, %v747_v40  ;;  %v745_v60 = vpop.permute.xlu0 %744  ;;  %v788_v4 = vsel %vm347_vm6, %v741_v28, %v709_v8  ;;  %v804_v23 = vsel %vm348_vm7, %v2620_v41, %v741_v28 }
 0x169   : > { %v885_v51 = vadd.f32 %v869_v33, %v837_v54  ;;  %v823_v27 = vadd.f32 %v807_v42, %v791_v30  ;;  %v790_v10 = vsel %vm347_vm6, %v745_v60, %v713_v43  ;;  %v806_v5 = vsel %vm348_vm7, %v2465_v47, %v745_v60 }
 0x16a   : > { %v822_v33 = vadd.f32 %v806_v5, %v790_v10  ;;  %v859_v8 = vadd.f32 %v779_v2, %v2874_v56  ;;  %v858_v42 = vadd.f32 %v778_v21, %v2876_v31  ;;  %v820_v47 = vadd.f32 %v804_v23, %v788_v4 }
 0x16b   : > { %v2999_v49 = vadd.f32 %v901_v6, %v885_v51  ;;  %v839_v40 = vmul.f32 0.0625, %v823_v27  ;;  %v751_v30 = vpop.permute.xlu1 %750  ;;  %v781_v56 = vsel %vm347_vm6, %v2878_v36, %v2854_v11  ;;  %v780_v31 = vsel %vm347_vm6, %v2880_v0, %v2858_v15 }
 0x16c   : > { %v793_v41 = vsel %vm347_vm6, %v751_v30, %v2894_v46  ;;  %v809_v43 = vsel %vm348_vm7, %v2531_v52, %v751_v30  ;;  %v838_v14 = vmul.f32 0.0625, %v822_v33  ;;  %v749_v54 = vpop.permute.xlu0 %748  ;;  %v868_v11 = vmul.f32 0.25, %v852_v1 }
 0x16d   : > { %v887_v28 = vadd.f32 %v871_v53, %v839_v40  ;;  %v825_v6 = vadd.f32 %v809_v43, %v793_v41  ;;  %934 = vrot.lane.b32.xlu1 %v2999_v49, %s2178_s20  ;;  %v792_v52 = vsel %vm347_vm6, %v749_v54, %v2896_v29  ;;  %v808_v46 = vsel %vm348_vm7, %v2511_v34, %v749_v54 }
 0x16e   : > { %v886_v62 = vadd.f32 %v870_v57, %v838_v14  ;;  %v824_v21 = vadd.f32 %v808_v46, %v792_v52  ;;  %v872_v27 = vmul.f32 0.25, %v856_v22  ;;  %v875_v60 = vmul.f32 0.25, %v859_v8 }
 0x16f   : > { %v3025_v53 = vadd.f32 %v903_v48, %v887_v28  ;;  %v841_v2 = vmul.f32 0.0625, %v825_v6  ;;  %v771_v51 = vpop.permute.xlu1 %770  ;;  %v782_v15 = vsel %vm347_vm6, %v2884_v38, %v2862_v16  ;;  %v836_v4 = vmul.f32 0.0625, %v820_v47 }
 0x170   : > { %v3032_v29 = vadd.f32 %v2938_v59, %v886_v62  ;;  %v840_v34 = vmul.f32 0.0625, %v824_v21  ;;  %v753_v48 = vpop.permute.xlu0 %752  ;;  %v861_v57 = vadd.f32 %v781_v56, %v2878_v36  ;;  %v860_v1 = vadd.f32 %v780_v31, %v2880_v0  ;;  %v4488_v62 = vld [vmem:[#allocation32_spill] sm:$0xff] }
 0x171   : > { %v889_v23 = vadd.f32 %v873_v32, %v841_v2  ;;  %938 = vrot.lane.b32.xlu1 %v3025_v53, %s2178_s20  ;;  %v794_v10 = vsel %vm347_vm6, %v753_v48, %v2900_v35  ;;  %v810_v16 = vsel %vm348_vm7, %v2550_v7, %v753_v48  ;;  %v874_v59 = vmul.f32 0.25, %v858_v42  ;;  %v4492_v48 = vld [vmem:[#allocation25_spill] sm:$0xff] }
 0x172   : > { %v888_v5 = vadd.f32 %v872_v27, %v840_v34  ;;  %v826_v22 = vadd.f32 %v810_v16, %v794_v10  ;;  %936 = vrot.lane.b32.xlu0 %v3032_v29, %s2178_s20  ;;  %v783_v0 = vsel %vm347_vm6, %v2882_v37, %v2860_v17  ;;  %v862_v35 = vadd.f32 %v782_v15, %v2884_v38  ;;  %v4491_v34 = vld [vmem:[#allocation35_spill] sm:$0xff] }
 0x173   : > { %v3045_v32 = vadd.f32 %v2941_v63, %v889_v23  ;;  %v757_v36 = vpop.permute.xlu1 %756  ;;  %v884_v40 = vadd.f32 %v868_v11, %v836_v4  ;;  %v877_v17 = vmul.f32 0.25, %v861_v57  ;;  %v876_v38 = vmul.f32 0.25, %v860_v1  ;;  %v4490_v11 = vld [vmem:[#allocation26_spill] sm:$0xff]  ;;  %v4493_v1 = vld [vmem:[#allocation39_spill] sm:$0xff] }
 0x174   : > { %v796_v7 = vsel %vm347_vm6, %v757_v36, %v2904_v13  ;;  %v812_v63 = vsel %vm348_vm7, %v2649_v25, %v757_v36  ;;  %v3061_v33 = vadd.f32 %v2944_v20, %v888_v5  ;;  %v842_v30 = vmul.f32 0.0625, %v826_v22  ;;  %v755_v42 = vpop.permute.xlu0 %754  ;;  %v4494_v5 = vld [vmem:[#allocation28_spill] sm:$0xff]  ;;  %v4495_v22 = vld [vmem:[#allocation30_spill] sm:$0xff] }
 0x175   : > { %v828_v8 = vadd.f32 %v812_v63, %v796_v7  ;;  %942 = vrot.lane.b32.xlu1 %v3045_v32, %s2178_s20  ;;  %v795_v13 = vsel %vm347_vm6, %v755_v42, %v2898_v44  ;;  %v811_v25 = vsel %vm348_vm7, %v2590_v24, %v755_v42  ;;  %v863_v41 = vadd.f32 %v783_v0, %v2882_v37  ;;  %v4487_v37 = vld [vmem:[#allocation38_spill] sm:$0xff]  ;;  %v4496_v0 = vld [vmem:[#allocation29_spill] sm:$0xff] }
 0x176   : > { %v785_v20 = vsel %vm347_vm6, %v2886_v39, %v2864_v18  ;;  %v784_v43 = vsel %vm347_vm6, %v2888_v61, %v2866_v26  ;;  %v827_v47 = vadd.f32 %v811_v25, %v795_v13  ;;  %940 = vrot.lane.b32.xlu0 %v3061_v33, %s2178_s20  ;;  %v878_v28 = vmul.f32 0.25, %v862_v35  ;;  %v4497_v35 = vld [vmem:[#allocation31_spill] sm:$0xff]  ;;  %v4498_v63 = vld [vmem:[#allocation33_spill] sm:$0xff] }
 0x177   : > { %v761_v44 = vpop.permute.xlu1 %760  ;;  %v844_v14 = vmul.f32 0.0625, %v828_v8  ;;  %v3089_v6 = vadd.f32 %v4487_v37, %v884_v40  ;;  %v890_v54 = vadd.f32 %v874_v59, %v842_v30  ;;  %v865_v52 = vadd.f32 %v785_v20, %v2886_v39 }
 0x178   : > { %v798_v24 = vsel %vm347_vm6, %v761_v44, %v2911_v58  ;;  %v814_v18 = vsel %vm348_vm7, %v2692_v12, %v761_v44  ;;  %v843_v26 = vmul.f32 0.0625, %v827_v47  ;;  %v759_v31 = vpop.permute.xlu0 %758  ;;  %v864_v46 = vadd.f32 %v784_v43, %v2888_v61  ;;  %v4489_v12 = vld [vmem:[#allocation36_spill] sm:$0xff]  ;;  %v4499_v43 = vld [vmem:[#allocation37_spill] sm:$0xff] }
 0x179   : > { %v830_v56 = vadd.f32 %v814_v18, %v798_v24  ;;  %v797_v2 = vsel %vm347_vm6, %v759_v31, %v4488_v62  ;;  %v813_v58 = vsel %vm348_vm7, %v2640_v19, %v759_v31  ;;  %v803_v21 = vsel %vm347_vm6, %v771_v51, %v4489_v12 }
 0x17a   : > { %v819_v27 = vsel %vm348_vm7, %v4490_v11, %v771_v51  ;;  %v891_v15 = vadd.f32 %v875_v60, %v843_v26  ;;  %v829_v39 = vadd.f32 %v813_v58, %v797_v2  ;;  %932 = vrot.lane.b32.xlu0 %v3089_v6, %s2178_s20  ;;  %v892_v4 = vadd.f32 %v876_v38, %v844_v14 }
 0x17b   : > { %v765_v61 = vpop.permute.xlu1 %764  ;;  %v846_v23 = vmul.f32 0.0625, %v830_v56  ;;  %v3114_v10 = vadd.f32 %v4493_v1, %v890_v54  ;;  %v787_v36 = vsel %vm347_vm6, %v4495_v22, %v4494_v5  ;;  %v786_v7 = vsel %vm347_vm6, %v4497_v35, %v4496_v0  ;;  %v4504_v56 = vld [vmem:[#allocation24_spill] sm:$0xff] }
 0x17c   : > { %v800_v19 = vsel %vm347_vm6, %v765_v61, %v4491_v34  ;;  %v816_v57 = vsel %vm348_vm7, %v4492_v48, %v765_v61  ;;  %v3117_v51 = vadd.f32 %v2960_v50, %v891_v15  ;;  %v845_v60 = vmul.f32 0.0625, %v829_v39  ;;  %v763_v59 = vpop.permute.xlu0 %762  ;;  %v4505_v15 = vld [vmem:[#allocation40_spill] sm:$0xff] }
 0x17d   : > { %v832_v16 = vadd.f32 %v816_v57, %v800_v19  ;;  %v799_v40 = vsel %vm347_vm6, %v763_v59, %v4498_v63  ;;  %v815_v50 = vsel %vm348_vm7, %v2678_v45, %v763_v59  ;;  %v879_v30 = vmul.f32 0.25, %v863_v41  ;;  %v4500_v45 = vld [vmem:[#allocation27_spill] sm:$0xff]  ;;  %v4501_v41 = vld [vmem:[#allocation41_spill] sm:$0xff] }
 0x17e   : > { %v835_v8 = vadd.f32 %v819_v27, %v803_v21  ;;  %v893_v42 = vadd.f32 %v877_v17, %v845_v60  ;;  %v831_v38 = vadd.f32 %v815_v50, %v799_v40  ;;  %944 = vrot.lane.b32.xlu0 %v3114_v10, %s2178_s20  ;;  %946 = vrot.lane.b32.xlu1 %v3117_v51, %s2178_s20  ;;  %v880_v62 = vmul.f32 0.25, %v864_v46 }
 0x17f   : > { %v769_v13 = vpop.permute.xlu1 %768  ;;  %v3138_v25 = vadd.f32 %v2957_v3, %v892_v4  ;;  %v894_v20 = vadd.f32 %v878_v28, %v846_v23  ;;  %v848_v14 = vmul.f32 0.0625, %v832_v16  ;;  %v867_v54 = vadd.f32 %v787_v36, %v4495_v22  ;;  %v4503_v28 = vld [vmem:[#allocation34_spill] sm:$0xff] }
 0x180   : > { %v802_v47 = vsel %vm347_vm6, %v769_v13, %v4499_v43  ;;  %v818_v17 = vsel %vm348_vm7, %v4500_v45, %v769_v13  ;;  %v3147_v44 = vadd.f32 %v4501_v41, %v893_v42  ;;  %v847_v24 = vmul.f32 0.0625, %v831_v38  ;;  %v767_v37 = vpop.permute.xlu0 %766 }
 0x181   : > { %v834_v18 = vadd.f32 %v818_v17, %v802_v47  ;;  %v912_v3 = vmul.f32 0.375, %v4492_v48  ;;  %v801_v26 = vsel %vm347_vm6, %v767_v37, %v4503_v28  ;;  %v817_v31 = vsel %vm348_vm7, %v4504_v56, %v767_v37 }
 0x182   : > { %4502 = vst [vmem:[#allocation38_spill] sm:$0xff] %v3147_v44  ;;  %v866_v2 = vadd.f32 %v786_v7, %v4497_v35  ;;  %v895_v58 = vadd.f32 %v879_v30, %v847_v24  ;;  %v833_v12 = vadd.f32 %v817_v31, %v801_v26  ;;  %948 = vrot.lane.b32.xlu0 %v3138_v25, %s2178_s20  ;;  %v881_v21 = vmul.f32 0.25, %v865_v52 }
 0x183   : > { %950 = vrot.lane.b32.xlu1 %v3147_v44, %s2178_s20  ;;  %v851_v27 = vmul.f32 0.0625, %v835_v8  ;;  %v3163_v39 = vadd.f32 %v4505_v15, %v894_v20  ;;  %v913_v61 = vmul.f32 0.375, %v4504_v56  ;;  %v896_v4 = vadd.f32 %v880_v62, %v848_v14 }
 0x184   : > { %v3167_v46 = vadd.f32 %v2969_v9, %v895_v58  ;;  %v850_v23 = vmul.f32 0.0625, %v834_v18  ;;  %v849_v34 = vmul.f32 0.0625, %v833_v12  ;;  %v883_v19 = vmul.f32 0.25, %v867_v54 }
 0x185   : > { %4506 = vst [vmem:[#allocation32_spill] sm:$0xff] %v3163_v39  ;;  %v882_v48 = vmul.f32 0.25, %v866_v2  ;;  %v915_v52 = vmul.f32 0.375, %v4490_v11  ;;  %v914_v1 = vmul.f32 0.375, %v4500_v45  ;;  %v3175_v16 = vadd.f32 %v912_v3, %v896_v4 }
 0x186   : > { %4507 = vst [vmem:[#allocation36_spill] sm:$0xff] %v3167_v46  ;;  %v897_v57 = vadd.f32 %v881_v21, %v849_v34  ;;  %952 = vrot.lane.b32.xlu0 %v3163_v39, %s2178_s20  ;;  %v899_v60 = vadd.f32 %v883_v19, %v851_v27  ;;  %v350_v4 = vand.u32 1, %v2909_v55 }
 0x187   : > { %954 = vrot.lane.b32.xlu1 %v3167_v46, %s2178_s20  ;;  %4508 = vst [vmem:[#allocation26_spill] sm:$0xff] %v3175_v16  ;;  %v898_v9 = vadd.f32 %v882_v48, %v850_v23 }
 0x188   : > { %v3177_v59 = vadd.f32 %v913_v61, %v897_v57  ;;  %v3183_v5 = vadd.f32 %v915_v52, %v899_v60  ;;  %vm3354_vm9 = vcmp.eq.s32.totalorder %v350_v4, 0 }
 0x189   : > { %v3185_v22 = vadd.f32 %v914_v1, %v898_v9 }
 0x18a   : > { %4509 = vst [vmem:[#allocation35_spill] sm:$0xff] %v3177_v59  ;;  %956 = vrot.lane.b32.xlu0 %v3175_v16, %s2178_s20 }
 0x18b   : > { %958 = vrot.lane.b32.xlu1 %v3177_v59, %s2178_s20  ;;  %4510 = vst [vmem:[#allocation25_spill] sm:$0xff] %v3185_v22 }
 0x18e   : > { %960 = vrot.lane.b32.xlu0 %v3185_v22, %s2178_s20 }
 0x18f   : > { %962 = vrot.lane.b32.xlu1 %v3183_v5, %s2178_s20 }
 0x192   : > { %964 = vrot.lane.b32.xlu0 %v3089_v6, %s2179_s26 }
 0x193   : > { %966 = vrot.lane.b32.xlu1 %v2999_v49, %s2179_s26 }
 0x196   : > { %968 = vrot.lane.b32.xlu0 %v3032_v29, %s2179_s26 }
 0x197   : > { %970 = vrot.lane.b32.xlu1 %v3025_v53, %s2179_s26 }
 0x19a   : > { %972 = vrot.lane.b32.xlu0 %v3061_v33, %s2179_s26 }
 0x19b   : > { %974 = vrot.lane.b32.xlu1 %v3045_v32, %s2179_s26 }
 0x19e   : > { %976 = vrot.lane.b32.xlu0 %v3114_v10, %s2179_s26 }
 0x19f   : > { %978 = vrot.lane.b32.xlu1 %v3117_v51, %s2179_s26 }
 0x1a2   : > { %980 = vrot.lane.b32.xlu0 %v3138_v25, %s2179_s26 }
 0x1a3   : > { %996 = vrot.lane.b32.xlu1 %v3089_v6, %s2180_s29 }
 0x1a6   : > { %998 = vrot.lane.b32.xlu0 %v2999_v49, %s2180_s29 }
 0x1a7   : > { %1026 = vrot.lane.b32.xlu1 %v3183_v5, %s2180_s29 }
 0x1aa   : > { %1028 = vrot.lane.b32.xlu0 %v3089_v6, %s2181_s10 }
 0x1ab   : > { %1030 = vrot.lane.b32.xlu1 %v2999_v49, %s2181_s10 }
 0x1ae   : > { %1058 = vrot.lane.b32.xlu0 %v3183_v5, %s2181_s10 }
 0x1af   : > { %1000 = vrot.lane.b32.xlu1 %v3032_v29, %s2180_s29 }
 0x1b2   : > { %1002 = vrot.lane.b32.xlu0 %v3025_v53, %s2180_s29 }
 0x1b3   : > { %1004 = vrot.lane.b32.xlu1 %v3061_v33, %s2180_s29 }
 0x1b6   : > { %1006 = vrot.lane.b32.xlu0 %v3045_v32, %s2180_s29 }
 0x1b7   : > { %1008 = vrot.lane.b32.xlu1 %v3114_v10, %s2180_s29 }
 0x1ba   : > { %1010 = vrot.lane.b32.xlu0 %v3117_v51, %s2180_s29 }
 0x1bb   : > { %1012 = vrot.lane.b32.xlu1 %v3138_v25, %s2180_s29 }
 0x1be   : > { %1014 = vrot.lane.b32.xlu0 %v3147_v44, %s2180_s29 }
 0x1bf   : > { %1016 = vrot.lane.b32.xlu1 %v3163_v39, %s2180_s29 }
 0x1c2   : > { %1018 = vrot.lane.b32.xlu0 %v3167_v46, %s2180_s29 }
 0x1c3   : > { %1020 = vrot.lane.b32.xlu1 %v3175_v16, %s2180_s29 }
 0x1c6   : > { %1022 = vrot.lane.b32.xlu0 %v3177_v59, %s2180_s29 }
 0x1c7   : > { %1024 = vrot.lane.b32.xlu1 %v3185_v22, %s2180_s29 }
 0x1ca   : > { %1032 = vrot.lane.b32.xlu0 %v3032_v29, %s2181_s10 }
 0x1cb   : > { %1034 = vrot.lane.b32.xlu1 %v3025_v53, %s2181_s10 }
 0x1ce   : > { %1036 = vrot.lane.b32.xlu0 %v3061_v33, %s2181_s10 }
 0x1cf   : > { %1038 = vrot.lane.b32.xlu1 %v3045_v32, %s2181_s10 }
 0x1d2   : > { %1040 = vrot.lane.b32.xlu0 %v3114_v10, %s2181_s10 }
 0x1d3   : > { %1042 = vrot.lane.b32.xlu1 %v3117_v51, %s2181_s10 }
 0x1d6   : > { %1044 = vrot.lane.b32.xlu0 %v3138_v25, %s2181_s10 }
 0x1d7   : > { %1046 = vrot.lane.b32.xlu1 %v3147_v44, %s2181_s10 }
 0x1da   : > { %1048 = vrot.lane.b32.xlu0 %v3163_v39, %s2181_s10 }
 0x1db   : > { %1050 = vrot.lane.b32.xlu1 %v3167_v46, %s2181_s10 }
 0x1de   : > { %1052 = vrot.lane.b32.xlu0 %v3175_v16, %s2181_s10 }
 0x1df   : > { %1054 = vrot.lane.b32.xlu1 %v3177_v59, %s2181_s10  ;;  %v935_v11 = vpop.permute.xlu1 %934 }
 0x1e2   : > { %1056 = vrot.lane.b32.xlu0 %v3185_v22, %s2181_s10 }
 0x1e3   : > { %994 = vrot.lane.b32.xlu1 %v3183_v5, %s2179_s26  ;;  %v3277_v0 = vpop.permute.xlu1 %938 }
 0x1e4   : > { %v3275_v36 = vpop.permute.xlu0 %936 }
 0x1e6   : > { %982 = vrot.lane.b32.xlu0 %v3147_v44, %s2179_s26 }
 0x1e7   : > { %984 = vrot.lane.b32.xlu1 %v3163_v39, %s2179_s26  ;;  %v3289_v7 = vpop.permute.xlu1 %942 }
 0x1e8   : > { %v3283_v35 = vpop.permute.xlu0 %940 }
 0x1ea   : > { %986 = vrot.lane.b32.xlu0 %v3167_v46, %s2179_s26 }
 0x1eb   : > { %988 = vrot.lane.b32.xlu1 %v3175_v16, %s2179_s26 }
 0x1ec   : > { %v933_v63 = vpop.permute.xlu0 %932 }
 0x1ee   : > { %990 = vrot.lane.b32.xlu0 %v3177_v59, %s2179_s26 }
 0x1ef   : > { %992 = vrot.lane.b32.xlu1 %v3185_v22, %s2179_s26 }
 0x1f0   : > { %v945_v40 = vpop.permute.xlu0 %944  ;;  %v947_v50 = vpop.permute.xlu1 %946 }
 0x1f4   : > { %v949_v30 = vpop.permute.xlu0 %948 }
 0x1f5   : > { %v3295_v8 = vpop.permute.xlu1 %950 }
 0x1f6   : > { %4511 = vst [vmem:[#allocation39_spill] sm:$0xff] %v3295_v8 }
 0x1f8   : > { %v3297_v42 = vpop.permute.xlu0 %952 }
 0x1f9   : > { %4512 = vst [vmem:[#allocation28_spill] sm:$0xff] %v3297_v42  ;;  %v3299_v38 = vpop.permute.xlu1 %954 }
 0x1fa   : > { %4513 = vst [vmem:[#allocation30_spill] sm:$0xff] %v3299_v38 }
 0x1fc   : > { %v3301_v13 = vpop.permute.xlu0 %956 }
 0x1fd   : > { %4514 = vst [vmem:[#allocation29_spill] sm:$0xff] %v3301_v13  ;;  %v3303_v20 = vpop.permute.xlu1 %958  ;;  %v3477_v13 = vmul.f32 0.75, %v3185_v22 }
 0x1fe   : > { %4515 = vst [vmem:[#allocation31_spill] sm:$0xff] %v3303_v20  ;;  %v3474_v20 = vmul.f32 0.75, %v3175_v16 }
 0x1ff   : > { %4530 = vst [vmem:[#allocation45_spill] sm:$0xff] %v3477_v13  ;;  %v3498_v13 = vmul.f32 0.75, %v3177_v59 }
 0x200   : > { %v3305_v43 = vpop.permute.xlu0 %960  ;;  %4529 = vst [vmem:[#allocation44_spill] sm:$0xff] %v3474_v20 }
 0x201   : > { %4516 = vst [vmem:[#allocation33_spill] sm:$0xff] %v3305_v43  ;;  %v3307_v47 = vpop.permute.xlu1 %962  ;;  %v3471_v43 = vmul.f32 0.75, %v3167_v46  ;;  %4532 = vst [vmem:[#allocation47_spill] sm:$0xff] %v3498_v13 }
 0x202   : > { %4517 = vst [vmem:[#allocation37_spill] sm:$0xff] %v3307_v47 }
 0x203   : > { %4528 = vst [vmem:[#allocation43_spill] sm:$0xff] %v3471_v43 }
 0x204   : > { %v965_v45 = vpop.permute.xlu0 %964 }
 0x205   : > { %v967_v17 = vpop.permute.xlu1 %966  ;;  %v1092_v27 = vsel %vm349_vm8, %v933_v63, %v965_v45 }
 0x206   : > { %v1093_v15 = vsel %vm349_vm8, %v935_v11, %v967_v17  ;;  %v1172_v61 = vadd.f32 %v1092_v27, %v933_v63  ;;  %v1140_v63 = vmul.f32 0.75, %v3089_v6 }
 0x207   : > { %v1173_v1 = vadd.f32 %v1093_v15, %v935_v11 }
 0x208   : > { %v3309_v41 = vpop.permute.xlu0 %968 }
 0x209   : > { %v3311_v14 = vpop.permute.xlu1 %970 }
 0x20a   : > { %v1095_v47 = vsel %vm349_vm8, %v3277_v0, %v3311_v14 }
 0x20c   : > { %v3313_v24 = vpop.permute.xlu0 %972 }
 0x20d   : > { %v3315_v18 = vpop.permute.xlu1 %974  ;;  %v1096_v13 = vsel %vm349_vm8, %v3283_v35, %v3313_v24 }
 0x210   : > { %v977_v37 = vpop.permute.xlu0 %976 }
 0x211   : > { %v979_v54 = vpop.permute.xlu1 %978  ;;  %v1098_v3 = vsel %vm349_vm8, %v945_v40, %v977_v37  ;;  %v1188_v37 = vmul.f32 0.5, %v1172_v61 }
 0x212   : > { %v1099_v28 = vsel %vm349_vm8, %v947_v50, %v979_v54  ;;  %v3322_v26 = vadd.f32 %v1098_v3, %v945_v40 }
 0x213   : > { %v3324_v56 = vadd.f32 %v1099_v28, %v947_v50 }
 0x214   : > { %v981_v31 = vpop.permute.xlu0 %980 }
 0x215   : > { %v997_v62 = vpop.permute.xlu1 %996  ;;  %v1100_v2 = vsel %vm349_vm8, %v949_v30, %v981_v31 }
 0x216   : > { %v3328_v58 = vadd.f32 %v1100_v2, %v949_v30  ;;  %v1141_v30 = vmul.f32 0.75, %v2999_v49 }
 0x218   : > { %v999_v12 = vpop.permute.xlu0 %998 }
 0x219   : > { %v1027_v21 = vpop.permute.xlu1 %1026 }
 0x21c   : > { %v1029_v23 = vpop.permute.xlu0 %1028 }
 0x21d   : > { %v1031_v34 = vpop.permute.xlu1 %1030  ;;  %v1060_v19 = vsel %vm347_vm6, %v1029_v23, %v997_v62  ;;  %v1076_v48 = vsel %vm348_vm7, %v3089_v6, %v1029_v23  ;;  %v1189_v6 = vmul.f32 0.5, %v1173_v1 }
 0x21e   : > { %v1061_v57 = vsel %vm347_vm6, %v1031_v34, %v999_v12  ;;  %v1077_v52 = vsel %vm348_vm7, %v2999_v49, %v1031_v34  ;;  %v1108_v60 = vadd.f32 %v1076_v48, %v1060_v19 }
 0x21f   : > { %v1109_v9 = vadd.f32 %v1077_v52, %v1061_v57  ;;  %v4520_v57 = vld [vmem:[#allocation22_spill] sm:$0xff] }
 0x220   : > { %v1124_v40 = vmul.f32 0.125, %v1108_v60  ;;  %v1059_v45 = vpop.permute.xlu0 %1058  ;;  %v3486_v38 = vadd.s32 40, %v4520_v57  ;;  %v3489_v42 = vadd.s32 48, %v4520_v57  ;;  %v3495_v20 = vadd.s32 56, %v4520_v57 }
 0x221   : > { %v1125_v50 = vmul.f32 0.125, %v1109_v9  ;;  %v3352_v17 = vpop.permute.xlu1 %1000  ;;  %v1075_v11 = vsel %vm347_vm6, %v1059_v45, %v1027_v21  ;;  %v1091_v3 = vsel %vm348_vm7, %v3183_v5, %v1059_v45  ;;  %v3506_v8 = vadd.s32 64, %v4520_v57 }
 0x222   : > { %v1156_v28 = vadd.f32 %v1140_v63, %v1124_v40  ;;  %v3363_v62 = vadd.f32 %v1091_v3, %v1075_v11  ;;  %v3431_v11 = vmul.f32 0.75, %v3032_v29  ;;  %v3434_v3 = vmul.f32 0.75, %v3025_v53  ;;  %4531 = vst [vmem:[#allocation46_spill] sm:$0xff] %v3495_v20 }
 0x223   : > { %v1157_v31 = vadd.f32 %v1141_v30, %v1125_v50  ;;  %4533 = vst [vmem:[#allocation48_spill] sm:$0xff] %v3506_v8  ;;  %v3528_v16 = vadd.s32 80, %v4520_v57 }
 0x224   : > { %v3367_v49 = vsel %vm3354_vm9, %v1156_v28, %v1188_v37  ;;  %v3373_v12 = vpop.permute.xlu0 %1002  ;;  %v3440_v28 = vmul.f32 0.75, %v3183_v5  ;;  %v3461_v5 = vmul.f32 0.75, %v3163_v39 }
 0x225   : > { %v3371_v2 = vsel %vm3354_vm9, %v1157_v31, %v1189_v6  ;;  %v3375_v21 = vpop.permute.xlu1 %1004  ;;  %v4421_v27 = vrot.slane %v3367_v49, 7  ;;  %v4420_v15 = vrot.slane %v3367_v49, 1  ;;  %v4419_v61 = vrot.slane %v3367_v49, 6  ;;  %4537 = vst [vmem:[#allocation52_spill] sm:$0xff] %v3528_v16 }
 0x226   : > { %v4418_v4 = vrot.slane %v3367_v49, 2  ;;  %v4425_v23 = vrot.slane %v3371_v2, 7  ;;  %v4424_v34 = vrot.slane %v3371_v2, 1  ;;  %v4423_v19 = vrot.slane %v3371_v2, 6  ;;  %4524 = vst [vmem:[#allocation24_spill] sm:$0xff] %v3461_v5 }
 0x227   : > { %v4422_v48 = vrot.slane %v3371_v2, 2  ;;  %v3437_v6 = vmul.f32 0.75, %v3045_v32  ;;  %v3443_v31 = vadd.s32 8, %v4520_v57  ;;  %v3492_v5 = vstv %s1540_s9 }
 0x228   : > { %v3391_v52 = vsel %vm368_vm0, %v4421_v27, %v4425_v23  ;;  %v3399_v1 = vsel %vm401_vm1, %v4420_v15, %v4424_v34  ;;  %v3407_v60 = vsel %vm434_vm2, %v4419_v61, %v4423_v19  ;;  %v3409_v9 = vpop.permute.xlu0 %1006  ;;  %v3449_v61 = vmul.f32 0.75, %v3114_v10 }
 0x229   : > { %4521 = vst [vmem:[#allocation27_spill] sm:$0xff] %v3399_v1  ;;  %v3411_v63 = vpop.permute.xlu1 %1008  ;;  %v3419_v40 = vsel %vm467_vm3, %v4418_v4, %v4422_v48  ;;  %v3446_v4 = vmul.f32 0.75, %v3061_v33  ;;  %v3452_v15 = vadd.s32 16, %v4520_v57  ;;  %v3455_v27 = vmul.f32 0.75, %v3117_v51 }
 0x22a   : > { %4522 = vst [vmem:[#allocation41_spill] sm:$0xff] %v3419_v40  ;;  %v3458_v48 = vmul.f32 0.75, %v3138_v25  ;;  %v3468_v23 = vmul.f32 0.75, %v3147_v44  ;;  %v3480_v1 = vadd.s32 24, %v4520_v57  ;;  %v3483_v40 = vadd.s32 32, %v4520_v57 }
 0x22b   : > { %v316_v43 = vand.u32 1, %v3443_v31  ;;  %v3509_v31 = vadd.s32 72, %v4520_v57  ;;  %v3566_v16 = vadd.s32 112, %v4520_v57  ;;  %v1429_v20 = vmul.f32 0.75, %v3371_v2 }
 0x22c   : > { %v3421_v50 = vpop.permute.xlu0 %1010  ;;  %4527 = vst [vmem:[#allocation42_spill] sm:$0xff] %v3468_v23  ;;  %v1094_v23 = vsel %vm349_vm8, %v3275_v36, %v3309_v41  ;;  %v1097_v41 = vsel %vm349_vm8, %v3289_v7, %v3315_v18  ;;  %v3550_v18 = vadd.s32 104, %v4520_v57 }
 0x22d   : > { %v3423_v30 = vpop.permute.xlu1 %1012  ;;  %4534 = vst [vmem:[#allocation49_spill] sm:$0xff] %v3509_v31  ;;  %vm3590_vm10 = vcmp.eq.s32.totalorder %v316_v43, 0 }
 0x230   : > { %v3426_v45 = vpop.permute.xlu0 %1014 }
 0x231   : > { %v3428_v37 = vpop.permute.xlu1 %1016 }
 0x232   : > { %4523 = vst [vmem:[#allocation34_spill] sm:$0xff] %v3428_v37  ;;  %v1176_v37 = vadd.f32 %v1096_v13, %v3283_v35 }
 0x234   : > { %v3463_v19 = vpop.permute.xlu0 %1018  ;;  %v1192_v39 = vmul.f32 0.5, %v1176_v37 }
 0x235   : > { %4525 = vst [vmem:[#allocation40_spill] sm:$0xff] %v3463_v19  ;;  %v3465_v34 = vpop.permute.xlu1 %1020  ;;  %v1174_v19 = vadd.f32 %v1094_v23, %v3275_v36  ;;  %v3547_v23 = vadd.s32 96, %v4520_v57 }
 0x236   : > { %4526 = vst [vmem:[#allocation22_spill] sm:$0xff] %v3465_v34  ;;  %v1177_v34 = vadd.f32 %v1097_v41, %v3289_v7 }
 0x238   : > { %v3523_v22 = vpop.permute.xlu0 %1022 }
 0x239   : > { %4535 = vst [vmem:[#allocation50_spill] sm:$0xff] %v3523_v22  ;;  %v3525_v59 = vpop.permute.xlu1 %1024  ;;  %v3538_v22 = vadd.s32 88, %v4520_v57 }
 0x23a   : > { %4536 = vst [vmem:[#allocation51_spill] sm:$0xff] %v3525_v59  ;;  %v1175_v59 = vadd.f32 %v1095_v47, %v3277_v0  ;;  %v1190_v47 = vmul.f32 0.5, %v1174_v19 }
 0x23c   : > { %v1033_v46 = vpop.permute.xlu0 %1032  ;;  %v1191_v14 = vmul.f32 0.5, %v1175_v59 }
 0x23d   : > { %v1035_v44 = vpop.permute.xlu1 %1034  ;;  %v1062_v0 = vsel %vm347_vm6, %v1033_v46, %v3352_v17  ;;  %v1078_v35 = vsel %vm348_vm7, %v3032_v29, %v1033_v46  ;;  %v1193_v17 = vmul.f32 0.5, %v1177_v34 }
 0x23e   : > { %v1063_v7 = vsel %vm347_vm6, %v1035_v44, %v3373_v12  ;;  %v1079_v13 = vsel %vm348_vm7, %v3025_v53, %v1035_v44  ;;  %v1110_v41 = vadd.f32 %v1078_v35, %v1062_v0  ;;  %v3588_v35 = vmul.f32 0.5, %v3324_v56 }
 0x23f   : > { %v1111_v36 = vadd.f32 %v1079_v13, %v1063_v7 }
 0x240   : > { %v1126_v29 = vmul.f32 0.125, %v1110_v41  ;;  %v1037_v31 = vpop.permute.xlu0 %1036 }
 0x241   : > { %v1127_v46 = vmul.f32 0.125, %v1111_v36  ;;  %v1039_v8 = vpop.permute.xlu1 %1038  ;;  %v1064_v53 = vsel %vm347_vm6, %v1037_v31, %v3375_v21  ;;  %v1080_v44 = vsel %vm348_vm7, %v3061_v33, %v1037_v31  ;;  %v3585_v21 = vmul.f32 0.5, %v3322_v26  ;;  %v4540_v31 = vld [vmem:[#allocation23_spill] sm:$0xff] }
 0x242   : > { %v1065_v59 = vsel %vm347_vm6, %v1039_v8, %v3409_v9  ;;  %v1081_v34 = vsel %vm348_vm7, %v3045_v32, %v1039_v8  ;;  %v1158_v19 = vadd.f32 %v3431_v11, %v1126_v29  ;;  %v1112_v36 = vadd.f32 %v1080_v44, %v1064_v53 }
 0x243   : > { %v1159_v37 = vadd.f32 %v3434_v3, %v1127_v46  ;;  %v1113_v0 = vadd.f32 %v1081_v34, %v1065_v59  ;;  %v3597_v8 = vmul.f32 0.125, %v3363_v62  ;;  %v4541_v44 = vrot.slane %v3371_v2, 7 }
 0x244   : > { %v1206_v11 = vsel %vm3354_vm9, %v1158_v19, %v1190_v47  ;;  %v1128_v3 = vmul.f32 0.125, %v1112_v36  ;;  %v4542_v59 = vrot.slane %v3371_v2, 1  ;;  %v4544_v19 = vrot.slane %v3371_v2, 2  ;;  %v1041_v9 = vpop.permute.xlu0 %1040 }
 0x245   : > { %v1207_v26 = vsel %vm3354_vm9, %v1159_v37, %v1191_v14  ;;  %v1222_v56 = vrot.slane %v1206_v11, 7  ;;  %v1254_v7 = vrot.slane %v1206_v11, 1  ;;  %v1286_v43 = vrot.slane %v1206_v11, 6 }
 0x246   : > { %v1318_v13 = vrot.slane %v1206_v11, 2  ;;  %v1223_v41 = vrot.slane %v1207_v26, 7  ;;  %v1255_v29 = vrot.slane %v1207_v26, 1  ;;  %v1287_v46 = vrot.slane %v1207_v26, 6 }
 0x247   : > { %v1129_v53 = vmul.f32 0.125, %v1113_v0  ;;  %v1249_v62 = vsel %vm368_vm0, %v4541_v44, %v1222_v56  ;;  %v1281_v47 = vsel %vm401_vm1, %v4542_v59, %v1254_v7  ;;  %v4543_v14 = vrot.slane %v3371_v2, 6 }
 0x248   : > { %v1345_v37 = vsel %vm467_vm3, %v4544_v19, %v1318_v13  ;;  %v4545_v36 = vand.u32 1, %v3452_v15  ;;  %v1461_v59 = vadd.f32 %v1281_v47, %v3391_v52  ;;  %v1248_v32 = vsel %vm368_vm0, %v1222_v56, %v1223_v41 }
 0x249   : > { %v1313_v34 = vsel %vm434_vm2, %v4543_v14, %v1286_v43  ;;  %v1397_v44 = vadd.f32 %v1345_v37, %v3407_v60  ;;  %v1280_v14 = vsel %vm401_vm1, %v1254_v7, %v1255_v29  ;;  %v1312_v15 = vsel %vm434_vm2, %v1286_v43, %v1287_v46 }
 0x24a   : > { %vm3621_vm11 = vcmp.eq.s32.totalorder %v4545_v36, 0  ;;  %v1319_v19 = vrot.slane %v1207_v26, 2  ;;  %v1462_v36 = vadd.f32 %v1280_v14, %v1249_v62  ;;  %v1430_v24 = vmul.f32 0.75, %v1206_v11 }
 0x24b   : > { %v1413_v12 = vmul.f32 0.125, %v1397_v44  ;;  %v1160_v60 = vadd.f32 %v3446_v4, %v1128_v3  ;;  %v1161_v52 = vadd.f32 %v3437_v6, %v1129_v53  ;;  %v1477_v47 = vmul.f32 0.5, %v1461_v59 }
 0x24c   : > { %v1344_v56 = vsel %vm467_vm3, %v1318_v13, %v1319_v19  ;;  %v1478_v7 = vmul.f32 0.5, %v1462_v36  ;;  %v1066_v2 = vsel %vm347_vm6, %v1041_v9, %v3411_v63  ;;  %v4548_v62 = vand.u32 1, %v3480_v1 }
 0x24d   : > { %v1445_v43 = vadd.f32 %v1429_v20, %v1413_v12  ;;  %v1398_v37 = vadd.f32 %v1344_v56, %v1313_v34  ;;  %v1208_v4 = vsel %vm3354_vm9, %v1160_v60, %v1192_v39  ;;  %v3651_v6 = vsel %vm3354_vm9, %v1161_v52, %v1193_v17  ;;  %v1953_v39 = vld [vmem:[%s2392_s28 + $0x8] sm:$0xff] }
 0x24e   : > { %vm3643_vm12 = vcmp.eq.s32.totalorder %v4548_v62, 0  ;;  %v1224_v3 = vrot.slane %v1208_v4, 7  ;;  %v1256_v13 = vrot.slane %v1208_v4, 1  ;;  %v1288_v53 = vrot.slane %v1208_v4, 6 }
 0x24f   : > { %v1320_v63 = vrot.slane %v1208_v4, 2  ;;  %v1493_v20 = vsel %vm3590_vm10, %v1445_v43, %v1477_v47  ;;  %v1414_v12 = vmul.f32 0.125, %v1398_v37  ;;  %v1225_v1 = vrot.slane %v3651_v6, 7  ;;  %v1954_v37 = vld [vmem:[%s2392_s28 + $0x10] sm:$0xff] }
 0x250   : > { %v1082_v34 = vsel %vm348_vm7, %v3114_v10, %v1041_v9  ;;  %1509 = vst [vmem:[%s3661_s8 + $0x8] sm:$0xff] %v1493_v20  ;;  %v1525_v17 = vsub.f32 %v1953_v39, %v1493_v20  ;;  %v1247_v44 = vsel %vm368_vm0, %v1223_v41, %v1224_v3  ;;  %v1279_v33 = vsel %vm401_vm1, %v1255_v29, %v1256_v13  ;;  %v1043_v29 = vpop.permute.xlu1 %1042 }
 0x251   : > { %v1311_v59 = vsel %vm434_vm2, %v1287_v46, %v1288_v53  ;;  %v1446_v14 = vadd.f32 %v1430_v24, %v1414_v12  ;;  %v1343_v10 = vsel %vm467_vm3, %v1319_v19, %v1320_v63  ;;  %v1463_v9 = vadd.f32 %v1279_v33, %v1248_v32  ;;  %v1045_v46 = vpop.permute.xlu0 %1044 }
 0x252   : > { %v4551_v36 = vand.u32 1, %v3483_v40  ;;  %v3683_v41 = vsel %vm368_vm0, %v1224_v3, %v1225_v1  ;;  %v3686_v24 = vmul.f32 %v3492_v5, %v1525_v17  ;;  %v1399_v52 = vadd.f32 %v1343_v10, %v1312_v15 }
 0x253   : > { %v1257_v32 = vrot.slane %v3651_v6, 1  ;;  %v1289_v40 = vrot.slane %v3651_v6, 6  ;;  %v1431_v19 = vmul.f32 0.75, %v1207_v26  ;;  %v1494_v47 = vsel %vm3621_vm11, %v1446_v14, %v1478_v7 }
 0x254   : > { %vm3675_vm13 = vcmp.eq.s32.totalorder %v4551_v36, 0  ;;  %v1479_v56 = vmul.f32 0.5, %v1463_v9  ;;  %v1321_v43 = vrot.slane %v3651_v6, 2  ;;  %1510 = vst [vmem:[%s3661_s8 + $0x10] sm:$0xff] %v1494_v47  ;;  %v1526_v62 = vsub.f32 %v1954_v37, %v1494_v47  ;;  %1563 = vst [vmem:[%s4192_s24 + $0x8] sm:$0xff] (!%p1814_p3), %v3686_v24 }
 0x255   : > { %v1415_v3 = vmul.f32 0.125, %v1399_v52  ;;  %v1278_v20 = vsel %vm401_vm1, %v1256_v13, %v1257_v32  ;;  %v1310_v15 = vsel %vm434_vm2, %v1288_v53, %v1289_v40  ;;  %v1114_v39 = vadd.f32 %v1082_v34, %v1066_v2  ;;  %v1047_v34 = vpop.permute.xlu1 %1046 }
 0x256   : > { %v1342_v12 = vsel %vm467_vm3, %v1320_v63, %v1321_v43  ;;  %v1464_v26 = vadd.f32 %v1278_v20, %v1247_v44  ;;  %v1067_v0 = vsel %vm347_vm6, %v1043_v29, %v3421_v50  ;;  %v3705_v7 = vmul.f32 %v3492_v5, %v1526_v62  ;;  %v1049_v50 = vpop.permute.xlu0 %1048  ;;  %v1956_v20 = vld [vmem:[%s2392_s28 + $0x20] sm:$0xff] }
 0x257   : > { %v1447_v17 = vadd.f32 %v1431_v19, %v1415_v3  ;;  %v1400_v33 = vadd.f32 %v1342_v12, %v1311_v59  ;;  %v1083_v13 = vsel %vm348_vm7, %v3117_v51, %v1043_v29  ;;  %v1196_v53 = vmul.f32 0.5, %v3328_v58  ;;  %v1955_v51 = vld [vmem:[%s2392_s28 + $0x18] sm:$0xff] }
 0x258   : > { %v1130_v63 = vmul.f32 0.125, %v1114_v39  ;;  %v1115_v44 = vadd.f32 %v1083_v13, %v1067_v0  ;;  %v1068_v2 = vsel %vm347_vm6, %v1045_v46, %v3423_v30  ;;  %v1432_v14 = vmul.f32 0.75, %v1208_v4  ;;  %1564 = vst [vmem:[%s4192_s24 + $0x10] sm:$0xff] (!%p1814_p3), %v3705_v7 }
 0x259   : > { %v1495_v10 = vsel %vm3643_vm12, %v1447_v17, %v1479_v56  ;;  %v1416_v9 = vmul.f32 0.125, %v1400_v33  ;;  %v1084_v59 = vsel %vm348_vm7, %v3138_v25, %v1045_v46  ;;  %v3723_v52 = vmul.f32 0.75, %v3367_v49  ;;  %v1051_v0 = vpop.permute.xlu1 %1050 }
 0x25a   : > { %1511 = vst [vmem:[%s3661_s8 + $0x18] sm:$0xff] %v1495_v10  ;;  %v1527_v58 = vsub.f32 %v1955_v51, %v1495_v10  ;;  %v1162_v36 = vadd.f32 %v3449_v61, %v1130_v63  ;;  %v1131_v29 = vmul.f32 0.125, %v1115_v44  ;;  %v1116_v30 = vadd.f32 %v1084_v59, %v1068_v2 }
 0x25b   : > { %v3727_v11 = vadd.f32 %v3440_v28, %v3597_v8  ;;  %v1448_v4 = vadd.f32 %v1432_v14, %v1416_v9  ;;  %v1480_v19 = vmul.f32 0.5, %v1464_v26  ;;  %v1433_v46 = vmul.f32 0.75, %v3651_v6 }
 0x25c   : > { %v3730_v25 = vmul.f32 %v3492_v5, %v1527_v58  ;;  %v4554_v61 = vand.u32 1, %v3486_v38  ;;  %v1210_v56 = vsel %vm3354_vm9, %v1162_v36, %v3585_v21  ;;  %v1163_v28 = vadd.f32 %v3455_v27, %v1131_v29  ;;  %v3752_v21 = vpop.permute.xlu0 %1052 }
 0x25d   : > { %v1496_v8 = vsel %vm3675_vm13, %v1448_v4, %v1480_v19  ;;  %v1226_v37 = vrot.slane %v1210_v56, 7  ;;  %v1258_v62 = vrot.slane %v1210_v56, 1  ;;  %v1290_v3 = vrot.slane %v1210_v56, 6  ;;  %v4566_v19 = vld [vmem:[#allocation32_spill] sm:$0xff] }
 0x25e   : > { %vm3735_vm14 = vcmp.eq.s32.totalorder %v4554_v61, 0  ;;  %1512 = vst [vmem:[%s3661_s8 + $0x20] sm:$0xff] %v1496_v8  ;;  %v1528_v12 = vsub.f32 %v1956_v20, %v1496_v8  ;;  %v1322_v38 = vrot.slane %v1210_v56, 2  ;;  %v3750_v26 = vsel %vm3354_vm9, %v1163_v28, %v3588_v35  ;;  %v1055_v28 = vpop.permute.xlu1 %1054  ;;  %v4570_v35 = vld [vmem:[#allocation26_spill] sm:$0xff]  ;;  %1565 = vst [vmem:[%s4192_s24 + $0x18] sm:$0xff] (!%p1814_p3), %v3730_v25 }
 0x25f   : > { %v1132_v39 = vmul.f32 0.125, %v1116_v30  ;;  %v1245_v27 = vsel %vm368_vm0, %v1225_v1, %v1226_v37  ;;  %v1277_v60 = vsel %vm401_vm1, %v1257_v32, %v1258_v62  ;;  %v1309_v17 = vsel %vm434_vm2, %v1289_v40, %v1290_v3 }
 0x260   : > { %v4557_v33 = vand.u32 1, %v3489_v42  ;;  %v1227_v13 = vrot.slane %v3750_v26, 7  ;;  %v3770_v63 = vmul.f32 %v3492_v5, %v1528_v12  ;;  %v1341_v6 = vsel %vm467_vm3, %v1321_v43, %v1322_v38  ;;  %v4560_v43 = vld [vmem:[#allocation38_spill] sm:$0xff]  ;;  %v1057_v8 = vpop.permute.xlu0 %1056 }
 0x261   : > { %v1465_v1 = vadd.f32 %v1277_v60, %v3683_v41  ;;  %v1259_v32 = vrot.slane %v3750_v26, 1  ;;  %v1401_v44 = vadd.f32 %v1341_v6, %v1310_v15  ;;  %v1291_v40 = vrot.slane %v3750_v26, 6 }
 0x262   : > { %vm3764_vm15 = vcmp.eq.s32.totalorder %v4557_v33, 0  ;;  %v1244_v42 = vsel %vm368_vm0, %v1226_v37, %v1227_v13  ;;  %v1323_v2 = vrot.slane %v3750_v26, 2  ;;  %v1164_v10 = vadd.f32 %v3458_v48, %v1132_v39  ;;  %v4561_v48 = vld [vmem:[#allocation46_spill] sm:$0xff]  ;;  %1566 = vst [vmem:[%s4192_s24 + $0x20] sm:$0xff] (!%p1814_p3), %v3770_v63 }
 0x263   : > { %v1276_v14 = vsel %vm401_vm1, %v1258_v62, %v1259_v32  ;;  %v1069_v41 = vsel %vm347_vm6, %v1047_v34, %v3426_v45  ;;  %v1085_v15 = vsel %vm348_vm7, %v4560_v43, %v1047_v34  ;;  %v1417_v9 = vmul.f32 0.125, %v1401_v44  ;;  %v4565_v34 = vld [vmem:[#allocation34_spill] sm:$0xff] }
 0x264   : > { %v1308_v59 = vsel %vm434_vm2, %v1290_v3, %v1291_v40  ;;  %v1340_v51 = vsel %vm467_vm3, %v1322_v38, %v1323_v2  ;;  %v1466_v58 = vadd.f32 %v1276_v14, %v1245_v27  ;;  %v4562_v29 = vand.u32 1, %v4561_v48 }
 0x265   : > { %v1402_v36 = vadd.f32 %v1340_v51, %v1309_v17  ;;  %v3805_v45 = vsel %vm3354_vm9, %v1164_v10, %v1196_v53  ;;  %v1070_v4 = vsel %vm347_vm6, %v1049_v50, %v4565_v34  ;;  %v1086_v61 = vsel %vm348_vm7, %v4566_v19, %v1049_v50  ;;  %v4567_v10 = vld [vmem:[#allocation40_spill] sm:$0xff]  ;;  %v983_v51 = vpop.permute.xlu0 %982 }
 0x266   : > { %vm3799_vm10 = vcmp.eq.s32.totalorder %v4562_v29, 0  ;;  %v1434_v37 = vmul.f32 0.75, %v1210_v56  ;;  %v1449_v62 = vadd.f32 %v1433_v46, %v1417_v9  ;;  %v1481_v3 = vmul.f32 0.5, %v1465_v1  ;;  %v1957_v46 = vld [vmem:[%s2392_s28 + $0x28] sm:$0xff]  ;;  %v4568_v9 = vld [vmem:[#allocation36_spill] sm:$0xff]  ;;  %v4569_v29 = vld [vmem:[#allocation22_spill] sm:$0xff] }
 0x267   : > { %v1260_v20 = vrot.slane %v3805_v45, 1  ;;  %v1418_v12 = vmul.f32 0.125, %v1402_v36  ;;  %v1435_v53 = vmul.f32 0.75, %v3750_v26  ;;  %v1324_v38 = vrot.slane %v3805_v45, 2 }
 0x268   : > { %v1117_v39 = vadd.f32 %v1085_v15, %v1069_v41  ;;  %v1497_v27 = vsel %vm3735_vm14, %v1449_v62, %v1481_v3  ;;  %v1482_v60 = vmul.f32 0.5, %v1466_v58  ;;  %v1118_v56 = vadd.f32 %v1086_v61, %v1070_v4  ;;  %v1958_v58 = vld [vmem:[%s2392_s28 + $0x30] sm:$0xff] }
 0x269   : > { %v1275_v50 = vsel %vm401_vm1, %v1259_v32, %v1260_v20  ;;  %1513 = vst [vmem:[%s3661_s8 + $0x28] sm:$0xff] %v1497_v27  ;;  %v1529_v17 = vsub.f32 %v1957_v46, %v1497_v27  ;;  %v1450_v33 = vadd.f32 %v1434_v37, %v1418_v12  ;;  %v1339_v6 = vsel %vm467_vm3, %v1323_v2, %v1324_v38  ;;  %v995_v2 = vpop.permute.xlu1 %994  ;;  %v4572_v37 = vld [vmem:[#allocation35_spill] sm:$0xff]  ;;  %v987_v30 = vpop.permute.xlu0 %986 }
 0x26a   : > { %v1467_v47 = vadd.f32 %v1275_v50, %v1244_v42  ;;  %v1228_v1 = vrot.slane %v3805_v45, 7  ;;  %v1292_v44 = vrot.slane %v3805_v45, 6  ;;  %v1403_v14 = vadd.f32 %v1339_v6, %v1308_v59  ;;  %v4574_v46 = vld [vmem:[#allocation39_spill] sm:$0xff] }
 0x26b   : > { %v1071_v32 = vsel %vm347_vm6, %v1051_v0, %v4567_v10  ;;  %v3834_v41 = vmul.f32 %v3492_v5, %v1529_v17  ;;  %v1498_v43 = vsel %vm3764_vm15, %v1450_v33, %v1482_v60  ;;  %v1133_v15 = vmul.f32 0.125, %v1117_v39  ;;  %v4575_v6 = vld [vmem:[#allocation51_spill] sm:$0xff]  ;;  %v1959_v10 = vld [vmem:[%s2392_s28 + $0x38] sm:$0xff] }
 0x26c   : > { %v1087_v42 = vsel %vm348_vm7, %v4568_v9, %v1051_v0  ;;  %1514 = vst [vmem:[%s3661_s8 + $0x30] sm:$0xff] %v1498_v43  ;;  %v1530_v59 = vsub.f32 %v1958_v58, %v1498_v43  ;;  %v1419_v36 = vmul.f32 0.125, %v1403_v14  ;;  %v1072_v34 = vsel %vm347_vm6, %v3752_v21, %v4569_v29  ;;  %v4571_v0 = vld [vmem:[#allocation50_spill] sm:$0xff] }
 0x26d   : > { %v1119_v48 = vadd.f32 %v1087_v42, %v1071_v32  ;;  %v1134_v4 = vmul.f32 0.125, %v1118_v56  ;;  %v1088_v19 = vsel %vm348_vm7, %v4570_v35, %v3752_v21  ;;  %v1073_v61 = vsel %vm347_vm6, %v1055_v28, %v4571_v0  ;;  %v4573_v21 = vld [vmem:[#allocation37_spill] sm:$0xff]  ;;  %1567 = vst [vmem:[%s4192_s24 + $0x28] sm:$0xff] (!%p1814_p3), %v3834_v41 }
 0x26e   : > { %v1089_v62 = vsel %vm348_vm7, %v4572_v37, %v1055_v28  ;;  %v3858_v3 = vmul.f32 %v3492_v5, %v1530_v59  ;;  %v1451_v12 = vadd.f32 %v1435_v53, %v1419_v36  ;;  %v1483_v39 = vmul.f32 0.5, %v1467_v47  ;;  %v4576_v47 = vld [vmem:[#allocation25_spill] sm:$0xff]  ;;  %v4578_v59 = vld [vmem:[#allocation24_spill] sm:$0xff]  ;;  %v4581_v37 = vld [vmem:[#allocation30_spill] sm:$0xff] }
 0x26f   : > { %v1120_v27 = vadd.f32 %v1088_v19, %v1072_v34  ;;  %v3861_v60 = vmul.f32 0.75, %v3805_v45  ;;  %v1135_v50 = vmul.f32 0.125, %v1119_v48  ;;  %v1107_v56 = vsel %vm349_vm8, %v4573_v21, %v995_v2  ;;  %v985_v2 = vpop.permute.xlu1 %984 }
 0x270   : > { %v1101_v17 = vsel %vm349_vm8, %v4574_v46, %v983_v51  ;;  %v1499_v28 = vsel %vm3799_vm10, %v1451_v12, %v1483_v39  ;;  %v1121_v33 = vadd.f32 %v1089_v62, %v1073_v61  ;;  %v1074_v53 = vsel %vm347_vm6, %v1057_v8, %v4575_v6  ;;  %v4577_v51 = vld [vmem:[#allocation42_spill] sm:$0xff]  ;;  %v4580_v61 = vld [vmem:[#allocation28_spill] sm:$0xff]  ;;  %1568 = vst [vmem:[%s4192_s24 + $0x30] sm:$0xff] (!%p1814_p3), %v3858_v3 }
 0x271   : > { %v1090_v14 = vsel %vm348_vm7, %v4576_v47, %v1057_v8  ;;  %1515 = vst [vmem:[%s3661_s8 + $0x38] sm:$0xff] %v1499_v28  ;;  %v1531_v32 = vsub.f32 %v1959_v10, %v1499_v28  ;;  %v1136_v43 = vmul.f32 0.125, %v1120_v27  ;;  %v1187_v9 = vadd.f32 %v1107_v56, %v4573_v21  ;;  %v4582_v62 = vld [vmem:[#allocation44_spill] sm:$0xff] }
 0x272   : > { %v1181_v42 = vadd.f32 %v1101_v17, %v4574_v46  ;;  %v1165_v58 = vadd.f32 %v4577_v51, %v1133_v15  ;;  %v1166_v36 = vadd.f32 %v4578_v59, %v1134_v4  ;;  %v1243_v8 = vsel %vm368_vm0, %v1227_v13, %v1228_v1  ;;  %v4579_v15 = vld [vmem:[#allocation43_spill] sm:$0xff] }
 0x273   : > { %v1307_v48 = vsel %vm434_vm2, %v1291_v40, %v1292_v44  ;;  %v3896_v29 = vmul.f32 %v3492_v5, %v1531_v32  ;;  %v1167_v34 = vadd.f32 %v4579_v15, %v1135_v50  ;;  %v1203_v4 = vmul.f32 0.5, %v1187_v9  ;;  %v989_v59 = vpop.permute.xlu1 %988 }
 0x274   : > { %v1197_v35 = vmul.f32 0.5, %v1181_v42  ;;  %v1137_v19 = vmul.f32 0.125, %v1121_v33  ;;  %v1122_v0 = vadd.f32 %v1090_v14, %v1074_v53  ;;  %v1102_v13 = vsel %vm349_vm8, %v4580_v61, %v985_v2 }
 0x275   : > { %v1103_v26 = vsel %vm349_vm8, %v4581_v37, %v987_v30  ;;  %v3906_v12 = vadd.f32 %v4582_v62, %v1136_v43  ;;  %v4583_v40 = vand.u32 1, %v4520_v57  ;;  %v3917_v27 = vsel %vm3354_vm9, %v3727_v11, %v1203_v4  ;;  %v4590_v30 = vld [vmem:[#allocation48_spill] sm:$0xff]  ;;  %v4594_v4 = vld [vmem:[#allocation41_spill] sm:$0xff]  ;;  %1569 = vst [vmem:[%s4192_s24 + $0x38] sm:$0xff] (!%p1814_p3), %v3896_v29 }
 0x276   : > { %v3921_v50 = vsel %vm3354_vm9, %v1165_v58, %v1197_v35  ;;  %v1182_v21 = vadd.f32 %v1102_v13, %v4580_v61  ;;  %v1235_v56 = vrot.slane %v3917_v27, 7  ;;  %v1267_v46 = vrot.slane %v3917_v27, 1  ;;  %v4595_v61 = vld [vmem:[#allocation27_spill] sm:$0xff] }
 0x277   : > { %vm3910_vm6 = vcmp.eq.s32.totalorder %v4583_v40, 0  ;;  %v1299_v17 = vrot.slane %v3917_v27, 6  ;;  %v1331_v28 = vrot.slane %v3917_v27, 2  ;;  %v1229_v33 = vrot.slane %v3921_v50, 7 }
 0x278   : > { %v1261_v6 = vrot.slane %v3921_v50, 1  ;;  %v1293_v11 = vrot.slane %v3921_v50, 6  ;;  %v1183_v53 = vadd.f32 %v1103_v26, %v4581_v37  ;;  %v4586_v47 = vrot.slane %v3367_v49, 7  ;;  %v4596_v37 = vld [vmem:[#allocation47_spill] sm:$0xff] }
 0x279   : > { %v4587_v10 = vrot.slane %v3367_v49, 1  ;;  %v4588_v43 = vrot.slane %v3367_v49, 6  ;;  %v4589_v42 = vrot.slane %v3367_v49, 2  ;;  %v4591_v51 = vand.u32 1, %v4590_v30 }
 0x27a   : > { %v1251_v14 = vsel %vm368_vm0, %v1235_v56, %v4586_v47  ;;  %v3964_v15 = vmul.f32 0.125, %v1122_v0  ;;  %v3976_v26 = vadd.f32 %v4596_v37, %v1137_v19  ;;  %v1274_v0 = vsel %vm401_vm1, %v1260_v20, %v1261_v6  ;;  %v4597_v19 = vld [vmem:[#allocation29_spill] sm:$0xff]  ;;  %v4602_v37 = vld [vmem:[#allocation31_spill] sm:$0xff] }
 0x27b   : > { %v3944_v32 = vsel %vm401_vm1, %v1267_v46, %v4587_v10  ;;  %v1315_v9 = vsel %vm434_vm2, %v1299_v17, %v4588_v43  ;;  %v1347_v2 = vsel %vm467_vm3, %v1331_v28, %v4589_v42  ;;  %vm3960_vm7 = vcmp.eq.s32.totalorder %v4591_v51, 0  ;;  %v4598_v51 = vld [vmem:[#allocation49_spill] sm:$0xff] }
 0x27c   : > { %v1348_v35 = vsel %vm267_vm4, %v4594_v4, %v1315_v9  ;;  %v3972_v49 = vsel %vm298_vm5, %v3917_v27, %v1347_v2  ;;  %v1460_v13 = vadd.f32 %v4595_v61, %v1251_v14  ;;  %v1325_v40 = vrot.slane %v3921_v50, 2 }
 0x27d   : > { %v1396_v62 = vadd.f32 %v1348_v35, %v4594_v4  ;;  %v1242_v47 = vsel %vm368_vm0, %v1228_v1, %v1229_v33  ;;  %v1468_v14 = vadd.f32 %v1274_v0, %v1243_v8  ;;  %v1198_v10 = vmul.f32 0.5, %v1182_v21  ;;  %v991_v8 = vpop.permute.xlu0 %990 }
 0x27e   : > { %v1104_v43 = vsel %vm349_vm8, %v4597_v19, %v989_v59  ;;  %v1306_v20 = vsel %vm434_vm2, %v1292_v44, %v1293_v11  ;;  %v1338_v42 = vsel %vm467_vm3, %v1324_v38, %v1325_v40  ;;  %v1199_v1 = vmul.f32 0.5, %v1183_v53 }
 0x27f   : > { %v1412_v9 = vmul.f32 0.125, %v1396_v62  ;;  %v1476_v21 = vmul.f32 0.5, %v1460_v13  ;;  %v1404_v2 = vadd.f32 %v1338_v42, %v1307_v48  ;;  %v1437_v30 = vmul.f32 0.75, %v3921_v50  ;;  %v4603_v42 = vld [vmem:[#allocation52_spill] sm:$0xff] }
 0x280   : > { %v4599_v59 = vand.u32 1, %v4598_v51  ;;  %v1214_v45 = vsel %vm3354_vm9, %v1166_v36, %v1198_v10  ;;  %v1484_v38 = vmul.f32 0.5, %v1468_v14  ;;  %v1184_v35 = vadd.f32 %v1104_v43, %v4597_v19  ;;  %v1960_v10 = vld [vmem:[%s2392_s28] sm:$0xff] }
 0x281   : > { %v1444_v44 = vadd.f32 %v3723_v52, %v1412_v9  ;;  %v1262_v53 = vrot.slane %v1214_v45, 1  ;;  %v1420_v48 = vmul.f32 0.125, %v1404_v2  ;;  %v1326_v61 = vrot.slane %v1214_v45, 2 }
 0x282   : > { %vm4006_vm4 = vcmp.eq.s32.totalorder %v4599_v59, 0  ;;  %v4016_v13 = vsel %vm3354_vm9, %v1167_v34, %v1199_v1  ;;  %v1105_v62 = vsel %vm349_vm8, %v4602_v37, %v991_v8  ;;  %v1230_v36 = vrot.slane %v1214_v45, 7  ;;  %v1961_v59 = vld [vmem:[%s2392_s28 + $0x40] sm:$0xff] }
 0x283   : > { %v1492_v0 = vsel %vm3910_vm6, %v1444_v44, %v1476_v21  ;;  %v1273_v52 = vsel %vm401_vm1, %v1261_v6, %v1262_v53  ;;  %v1294_v14 = vrot.slane %v1214_v45, 6  ;;  %v1452_v34 = vadd.f32 %v3861_v60, %v1420_v48 }
 0x284   : > { %1508 = vst [vmem:[%s3661_s8] sm:$0xff] %v1492_v0  ;;  %v1524_v19 = vsub.f32 %v1960_v10, %v1492_v0  ;;  %v1337_v43 = vsel %vm467_vm3, %v1325_v40, %v1326_v61  ;;  %v1469_v9 = vadd.f32 %v1273_v52, %v1242_v47  ;;  %v4604_v1 = vand.u32 1, %v4603_v42  ;;  %v993_v0 = vpop.permute.xlu1 %992 }
 0x285   : > { %v1405_v8 = vadd.f32 %v1337_v43, %v1306_v20  ;;  %v1438_v6 = vmul.f32 0.75, %v1214_v45  ;;  %v1231_v21 = vrot.slane %v4016_v13, 7  ;;  %v1263_v2 = vrot.slane %v4016_v13, 1 }
 0x286   : > { %vm4032_vm5 = vcmp.eq.s32.totalorder %v4604_v1, 0  ;;  %v4039_v51 = vmul.f32 %v3492_v5, %v1524_v19  ;;  %v1500_v60 = vsel %vm3960_vm7, %v1452_v34, %v1484_v38  ;;  %v1295_v40 = vrot.slane %v4016_v13, 6 }
 0x287   : > { %v1327_v47 = vrot.slane %v4016_v13, 2  ;;  %1516 = vst [vmem:[%s3661_s8 + $0x40] sm:$0xff] %v1500_v60  ;;  %v1532_v44 = vsub.f32 %v1961_v59, %v1500_v60  ;;  %v1241_v20 = vsel %vm368_vm0, %v1229_v33, %v1230_v36  ;;  %v1421_v45 = vmul.f32 0.125, %v1405_v8 }
 0x288   : > { %v1272_v48 = vsel %vm401_vm1, %v1262_v53, %v1263_v2  ;;  %v1305_v58 = vsel %vm434_vm2, %v1293_v11, %v1294_v14  ;;  %v1485_v38 = vmul.f32 0.5, %v1469_v9  ;;  %v1200_v43 = vmul.f32 0.5, %v1184_v35  ;;  %v4607_v9 = vld [vmem:[#allocation33_spill] sm:$0xff]  ;;  %1562 = vst [vmem:[%s4192_s24] sm:$0xff] (!%p1814_p3), %v4039_v51 }
 0x289   : > { %v1336_v52 = vsel %vm467_vm3, %v1326_v61, %v1327_v47  ;;  %v1470_v10 = vadd.f32 %v1272_v48, %v1241_v20  ;;  %v4060_v19 = vmul.f32 %v3492_v5, %v1532_v44  ;;  %v1453_v33 = vadd.f32 %v1437_v30, %v1421_v45 }
 0x28a   : > { %v1406_v34 = vadd.f32 %v1336_v52, %v1305_v58  ;;  %v1240_v53 = vsel %vm368_vm0, %v1230_v36, %v1231_v21  ;;  %v1304_v50 = vsel %vm434_vm2, %v1294_v14, %v1295_v40  ;;  %v1185_v11 = vadd.f32 %v1105_v62, %v4602_v37  ;;  %v1962_v37 = vld [vmem:[%s2392_s28 + $0x48] sm:$0xff] }
 0x28b   : > { %v1106_v61 = vsel %vm349_vm8, %v4607_v9, %v993_v0  ;;  %v1501_v42 = vsel %vm4006_vm4, %v1453_v33, %v1485_v38  ;;  %v1486_v8 = vmul.f32 0.5, %v1470_v10  ;;  %v4608_v30 = vand.u32 1, %v3538_v22  ;;  %1570 = vst [vmem:[%s4192_s24 + $0x40] sm:$0xff] (!%p1814_p3), %v4060_v19 }
 0x28c   : > { %v1422_v1 = vmul.f32 0.125, %v1406_v34  ;;  %v1216_v36 = vsel %vm3354_vm9, %v3906_v12, %v1200_v43  ;;  %1517 = vst [vmem:[%s3661_s8 + $0x48] sm:$0xff] %v1501_v42  ;;  %v1533_v62 = vsub.f32 %v1962_v37, %v1501_v42  ;;  %v1201_v44 = vmul.f32 0.5, %v1185_v11 }
 0x28d   : > { %vm4074_vm11 = vcmp.eq.s32.totalorder %v4608_v30, 0  ;;  %v1232_v55 = vrot.slane %v1216_v36, 7  ;;  %v1264_v14 = vrot.slane %v1216_v36, 1  ;;  %v1296_v4 = vrot.slane %v1216_v36, 6 }
 0x28e   : > { %v1454_v60 = vadd.f32 %v1438_v6, %v1422_v1  ;;  %v1328_v59 = vrot.slane %v1216_v36, 2  ;;  %v1186_v22 = vadd.f32 %v1106_v61, %v4607_v9  ;;  %v4085_v20 = vmul.f32 %v3492_v5, %v1533_v62 }
 0x28f   : > { %v1239_v45 = vsel %vm368_vm0, %v1231_v21, %v1232_v55  ;;  %v1271_v12 = vsel %vm401_vm1, %v1263_v2, %v1264_v14  ;;  %v1303_v48 = vsel %vm434_vm2, %v1295_v40, %v1296_v4  ;;  %v1217_v38 = vsel %vm3354_vm9, %v3976_v26, %v1201_v44  ;;  %v1963_v21 = vld [vmem:[%s2392_s28 + $0x50] sm:$0xff]  ;;  %v4611_v40 = vld [vmem:[#allocation45_spill] sm:$0xff] }
 0x290   : > { %v1502_v0 = vsel %vm4032_vm5, %v1454_v60, %v1486_v8  ;;  %v1335_v6 = vsel %vm467_vm3, %v1327_v47, %v1328_v59  ;;  %v1471_v58 = vadd.f32 %v1271_v12, %v1240_v53  ;;  %vm314_vm8 = vcmp.eq.s32.totalorder %v4540_v31, 127  ;;  %v1964_v12 = vld [vmem:[%s2392_s28 + $0x58] sm:$0xff]  ;;  %1571 = vst [vmem:[%s4192_s24 + $0x48] sm:$0xff] (!%p1814_p3), %v4085_v20 }
 0x291   : > { %1518 = vst [vmem:[%s3661_s8 + $0x50] sm:$0xff] %v1502_v0  ;;  %v1534_v52 = vsub.f32 %v1963_v21, %v1502_v0  ;;  %v1407_v2 = vadd.f32 %v1335_v6, %v1304_v50  ;;  %v1233_v10 = vrot.slane %v1217_v38, 7  ;;  %v1265_v33 = vrot.slane %v1217_v38, 1 }
 0x292   : > { %v1170_v39 = vadd.f32 %v4611_v40, %v3964_v15  ;;  %v1439_v34 = vmul.f32 0.75, %v4016_v13  ;;  %v1297_v43 = vrot.slane %v1217_v38, 6  ;;  %v1329_v47 = vrot.slane %v1217_v38, 2 }
 0x293   : > { %v4107_v53 = vmul.f32 %v3492_v5, %v1534_v52  ;;  %v1423_v11 = vmul.f32 0.125, %v1407_v2  ;;  %v1238_v26 = vsel %vm368_vm0, %v1232_v55, %v1233_v10  ;;  %v1270_v9 = vsel %vm401_vm1, %v1264_v14, %v1265_v33 }
 0x294   : > { %v1302_v50 = vsel %vm434_vm2, %v1296_v4, %v1297_v43  ;;  %v1334_v15 = vsel %vm467_vm3, %v1328_v59, %v1329_v47  ;;  %v1472_v13 = vadd.f32 %v1270_v9, %v1239_v45  ;;  %v1202_v61 = vmul.f32 0.5, %v1186_v22 }
 0x295   : > { %v1455_v42 = vadd.f32 %v1439_v34, %v1423_v11  ;;  %v1487_v1 = vmul.f32 0.5, %v1471_v58  ;;  %v4612_v8 = vand.u32 1, %v3547_v23  ;;  %v1408_v37 = vadd.f32 %v1334_v15, %v1303_v48  ;;  %1572 = vst [vmem:[%s4192_s24 + $0x50] sm:$0xff] (!%p1814_p3), %v4107_v53 }
 0x296   : > { %v1443_v62 = vmul.f32 0.75, %v3917_v27  ;;  %v1440_v55 = vmul.f32 0.75, %v1216_v36  ;;  %v1441_v14 = vmul.f32 0.75, %v1217_v38  ;;  %v1218_v4 = vsel %vm3354_vm9, %v1170_v39, %v1202_v61 }
 0x297   : > { %vm4119_vm12 = vcmp.eq.s32.totalorder %v4612_v8, 0  ;;  %v1503_v60 = vsel %vm4074_vm11, %v1455_v42, %v1487_v1  ;;  %v1424_v59 = vmul.f32 0.125, %v1408_v37  ;;  %v4615_v44 = vand.u32 1, %v3550_v18 }
 0x298   : > { %v1234_v22 = vrot.slane %v1218_v4, 7  ;;  %v1266_v45 = vrot.slane %v1218_v4, 1  ;;  %1519 = vst [vmem:[%s3661_s8 + $0x58] sm:$0xff] %v1503_v60  ;;  %v1535_v48 = vsub.f32 %v1964_v12, %v1503_v60  ;;  %v1488_v36 = vmul.f32 0.5, %v1472_v13 }
 0x299   : > { %vm4130_vm13 = vcmp.eq.s32.totalorder %v4615_v44, 0  ;;  %v1298_v54 = vrot.slane %v1218_v4, 6  ;;  %v1330_v0 = vrot.slane %v1218_v4, 2  ;;  %v1456_v6 = vadd.f32 %v1440_v55, %v1424_v59  ;;  %v1968_v59 = vld [vmem:[%s2392_s28 + $0x78] sm:$0xff] }
 0x29a   : > { %v1236_v18 = vsel %vm368_vm0, %v1234_v22, %v1235_v56  ;;  %v1237_v35 = vsel %vm368_vm0, %v1233_v10, %v1234_v22  ;;  %v1268_v58 = vsel %vm401_vm1, %v1266_v45, %v1267_v46  ;;  %v4147_v38 = vmul.f32 %v3492_v5, %v1535_v48 }
 0x29b   : > { %v1269_v21 = vsel %vm401_vm1, %v1265_v33, %v1266_v45  ;;  %v1300_v52 = vsel %vm434_vm2, %v1298_v54, %v1299_v17  ;;  %v1301_v56 = vsel %vm434_vm2, %v1297_v43, %v1298_v54  ;;  %v1504_v2 = vsel %vm4119_vm12, %v1456_v6, %v1488_v36  ;;  %v1965_v17 = vld [vmem:[%s2392_s28 + $0x60] sm:$0xff] }
 0x29c   : > { %v1332_v46 = vsel %vm467_vm3, %v1330_v0, %v1331_v28  ;;  %v1333_v10 = vsel %vm467_vm3, %v1329_v47, %v1330_v0  ;;  %v1395_v33 = vsel %vm314_vm8, %v1236_v18, %v3944_v32  ;;  %1520 = vst [vmem:[%s3661_s8 + $0x60] sm:$0xff] %v1504_v2  ;;  %v1536_v40 = vsub.f32 %v1965_v17, %v1504_v2 }
 0x29d   : > { %v1409_v39 = vadd.f32 %v1333_v10, %v1302_v50  ;;  %v1410_v34 = vadd.f32 %v1332_v46, %v1301_v56  ;;  %v1411_v43 = vadd.f32 %v3972_v49, %v1300_v52  ;;  %v1442_v11 = vmul.f32 0.75, %v1218_v4  ;;  %v1967_v4 = vld [vmem:[%s2392_s28 + $0x70] sm:$0xff]  ;;  %1573 = vst [vmem:[%s4192_s24 + $0x58] sm:$0xff] (!%p1814_p3), %v4147_v38 }
 0x29e   : > { %v1473_v9 = vadd.f32 %v1269_v21, %v1238_v26  ;;  %v1474_v27 = vadd.f32 %v1268_v58, %v1237_v35  ;;  %v1475_v15 = vadd.f32 %v1395_v33, %v1236_v18  ;;  %v4172_v28 = vmul.f32 %v3492_v5, %v1536_v40 }
 0x29f   : > { %v1425_v57 = vmul.f32 0.125, %v1409_v39  ;;  %v1426_v47 = vmul.f32 0.125, %v1410_v34  ;;  %v1427_v32 = vmul.f32 0.125, %v1411_v43  ;;  %v4618_v13 = vand.u32 1, %v3566_v16  ;;  %v1966_v16 = vld [vmem:[%s2392_s28 + $0x68] sm:$0xff] }
 0x2a0   : > { %v4619_v50 = vand.u32 1, %v4540_v31  ;;  %v1489_v49 = vmul.f32 0.5, %v1473_v9  ;;  %v1491_v26 = vmul.f32 0.5, %v1475_v15  ;;  %v1490_v8 = vmul.f32 0.5, %v1474_v27  ;;  %1561 = sbr.rel (%p1814_p3) target bundleno = 682 (0x2aa), region = 40  ;;  %1574 = vst [vmem:[%s4192_s24 + $0x60] sm:$0xff] (!%p1814_p3), %v4172_v28 }
 0x2a1   : > { %vm345_vm0 = vcmp.eq.s32.totalorder %v4618_v13, 0  ;;  %v1457_v61 = vadd.f32 %v1441_v14, %v1425_v57  ;;  %v1458_v42 = vadd.f32 %v1442_v11, %v1426_v47  ;;  %v1459_v1 = vadd.f32 %v1443_v62, %v1427_v32 }
 0x2a2   : > { %vm346_vm1 = vcmp.eq.s32.totalorder %v4619_v50, 0 }
 0x2a3   : > { %v1505_v30 = vsel %vm4130_vm13, %v1457_v61, %v1489_v49  ;;  %v1506_v37 = vsel %vm345_vm0, %v1458_v42, %v1490_v8  ;;  %v1507_v55 = vsel %vm346_vm1, %v1459_v1, %v1491_v26 }
 0x2a4   : > { %1521 = vst [vmem:[%s3661_s8 + $0x68] sm:$0xff] %v1505_v30  ;;  %1522 = vst [vmem:[%s3661_s8 + $0x70] sm:$0xff] %v1506_v37  ;;  %v1537_v31 = vsub.f32 %v1966_v16, %v1505_v30  ;;  %v1538_v60 = vsub.f32 %v1967_v4, %v1506_v37  ;;  %v1539_v44 = vsub.f32 %v1968_v59, %v1507_v55 }
 0x2a5   : > { %1523 = vst [vmem:[%s3661_s8 + $0x78] sm:$0xff] %v1507_v55 }
 0x2a6   : > { %v1555_v14 = vmul.f32 %v3492_v5, %v1537_v31  ;;  %v1556_v62 = vmul.f32 %v3492_v5, %v1538_v60  ;;  %v4189_v22 = vmul.f32 %v3492_v5, %v1539_v44 }
 0x2a8   : > { %1575 = vst [vmem:[%s4192_s24 + $0x68] sm:$0xff] %v1555_v14  ;;  %1576 = vst [vmem:[%s4192_s24 + $0x70] sm:$0xff] %v1556_v62 }
 0x2a9   : > { %1577 = vst [vmem:[%s4192_s24 + $0x78] sm:$0xff] %v4189_v22 }
 0x2aa PF: > { %p1815_p8 = scmp.eq.s32.totalorder %s2156_s18, 0 }
 0x2ab   : > { %v1582_v5 = vld [vmem:[%s4192_s24] sm:$0xff] (!%p1815_p8)  ;;  %v1583_v23 = vld [vmem:[%s4192_s24 + $0x8] sm:$0xff] (!%p1815_p8)  ;;  %v1584_v45 = vld [vmem:[%s4192_s24 + $0x10] sm:$0xff] (!%p1815_p8) }
 0x2ac   : > { %1581 = sbr.rel (%p1815_p8) target bundleno = 694 (0x2b6), region = 44  ;;  %v1598_v12 = vadd.f32 (!%p1815_p8), %v1582_v5, %v4039_v51  ;;  %v1599_v48 = vadd.f32 (!%p1815_p8), %v1583_v23, %v3686_v24  ;;  %v1600_v36 = vadd.f32 (!%p1815_p8), %v1584_v45, %v3705_v7  ;;  %v1585_v54 = vld [vmem:[%s4192_s24 + $0x18] sm:$0xff] (!%p1815_p8)  ;;  %v1586_v0 = vld [vmem:[%s4192_s24 + $0x20] sm:$0xff] (!%p1815_p8)  ;;  %v1587_v6 = vld [vmem:[%s4192_s24 + $0x28] sm:$0xff] (!%p1815_p8) }
 0x2ad   : > { %v1601_v18 = vadd.f32 (!%p1815_p8), %v1585_v54, %v3730_v25  ;;  %v1602_v35 = vadd.f32 (!%p1815_p8), %v1586_v0, %v3770_v63  ;;  %v1603_v58 = vadd.f32 (!%p1815_p8), %v1587_v6, %v3834_v41  ;;  %v1588_v51 = vld [vmem:[%s4192_s24 + $0x30] sm:$0xff] (!%p1815_p8)  ;;  %v1589_v21 = vld [vmem:[%s4192_s24 + $0x38] sm:$0xff] (!%p1815_p8)  ;;  %v1590_v24 = vld [vmem:[%s4192_s24 + $0x40] sm:$0xff] (!%p1815_p8) }
 0x2ae   : > { %1614 = vst [vmem:[%s4192_s24] sm:$0xff] (!%p1815_p8), %v1598_v12  ;;  %1615 = vst [vmem:[%s4192_s24 + $0x8] sm:$0xff] (!%p1815_p8), %v1599_v48  ;;  %v1604_v7 = vadd.f32 (!%p1815_p8), %v1588_v51, %v3858_v3  ;;  %v1605_v25 = vadd.f32 (!%p1815_p8), %v1589_v21, %v3896_v29  ;;  %v1606_v63 = vadd.f32 (!%p1815_p8), %v1590_v24, %v4060_v19  ;;  %v1591_v52 = vld [vmem:[%s4192_s24 + $0x48] sm:$0xff] (!%p1815_p8)  ;;  %v1592_v41 = vld [vmem:[%s4192_s24 + $0x50] sm:$0xff] (!%p1815_p8) }
 0x2af   : > { %1616 = vst [vmem:[%s4192_s24 + $0x10] sm:$0xff] (!%p1815_p8), %v1600_v36  ;;  %v1593_v56 = vld [vmem:[%s4192_s24 + $0x58] sm:$0xff] (!%p1815_p8)  ;;  %1617 = vst [vmem:[%s4192_s24 + $0x18] sm:$0xff] (!%p1815_p8), %v1601_v18  ;;  %v1607_v2 = vadd.f32 (!%p1815_p8), %v1591_v52, %v4085_v20  ;;  %v1608_v3 = vadd.f32 (!%p1815_p8), %v1592_v41, %v4107_v53  ;;  %v1594_v46 = vld [vmem:[%s4192_s24 + $0x60] sm:$0xff] (!%p1815_p8) }
 0x2b0   : > { %1618 = vst [vmem:[%s4192_s24 + $0x20] sm:$0xff] (!%p1815_p8), %v1602_v35  ;;  %1619 = vst [vmem:[%s4192_s24 + $0x28] sm:$0xff] (!%p1815_p8), %v1603_v58  ;;  %v1609_v29 = vadd.f32 (!%p1815_p8), %v1593_v56, %v4147_v38  ;;  %v1595_v19 = vld [vmem:[%s4192_s24 + $0x68] sm:$0xff] (!%p1815_p8)  ;;  %v1596_v10 = vld [vmem:[%s4192_s24 + $0x70] sm:$0xff] (!%p1815_p8)  ;;  %v1610_v33 = vadd.f32 (!%p1815_p8), %v1594_v46, %v4172_v28 }
 0x2b1   : > { %1620 = vst [vmem:[%s4192_s24 + $0x30] sm:$0xff] (!%p1815_p8), %v1604_v7  ;;  %1621 = vst [vmem:[%s4192_s24 + $0x38] sm:$0xff] (!%p1815_p8), %v1605_v25  ;;  %v1611_v17 = vadd.f32 (!%p1815_p8), %v1595_v19, %v1555_v14  ;;  %v1612_v40 = vadd.f32 (!%p1815_p8), %v1596_v10, %v1556_v62  ;;  %v1597_v39 = vld [vmem:[%s4192_s24 + $0x78] sm:$0xff] (!%p1815_p8) }
 0x2b2   : > { %1622 = vst [vmem:[%s4192_s24 + $0x40] sm:$0xff] (!%p1815_p8), %v1606_v63  ;;  %1623 = vst [vmem:[%s4192_s24 + $0x48] sm:$0xff] (!%p1815_p8), %v1607_v2  ;;  %v1613_v20 = vadd.f32 (!%p1815_p8), %v1597_v39, %v4189_v22 }
 0x2b3   : > { %1624 = vst [vmem:[%s4192_s24 + $0x50] sm:$0xff] %v1608_v3  ;;  %1625 = vst [vmem:[%s4192_s24 + $0x58] sm:$0xff] %v1609_v29 }
 0x2b4   : > { %1626 = vst [vmem:[%s4192_s24 + $0x60] sm:$0xff] %v1610_v33  ;;  %1627 = vst [vmem:[%s4192_s24 + $0x68] sm:$0xff] %v1611_v17 }
 0x2b5   : > { %1628 = vst [vmem:[%s4192_s24 + $0x70] sm:$0xff] %v1612_v40  ;;  %1629 = vst [vmem:[%s4192_s24 + $0x78] sm:$0xff] %v1613_v20 }
 0x2b6 PF: > { %s1824_s25 = sshll.u32 %s2160_s19, 11  ;;  %s1649_s22 = sshll.u32 %s4192_s24, 4  ;;  %s4279_s22 = int_to_ptr.vmem [resolvable:$true] %s1649_s22 }
 0x2b7   : > { %s4276_s12 = scalar_lea.hbm %s4389_s2, %s1824_s25  ;;  %s4283_s5 = scalar_lea.sflag [#allocation4], %s222_s11 }
 0x2b8   : > { %s2014_s28 = scalar_lea.vmem %s4279_s22, 2048  ;;  %p4620_p4 = scmp.ne.s32.totalorder %s4452_s30, 0 }
 0x2b9   : > { %p2015_p1 = scmp.ne.s32.totalorder %s4279_s22, %s2014_s28  ;;  %s2182_s20 = smov [#allocation7]  }
 0x2ba   : > { %s2018_s26 = sshll.u32 %s2182_s20, 4  ;;  %s2019_s26 = int_to_ptr.vmem [resolvable:$false] %s2018_s26 }
 0x2bb   : > { %p2016_p10 = pnand %p2015_p1, %p4620_p4  ;;  %s2020_s29 = scalar_lea.vmem %s2019_s26, 4096 }
 0x2bc   : > { %p2021_p12 = scmp.lt.s32.totalorder %s4279_s22, %s2019_s26  ;;  %p2022_p13 = scmp.lt.s32.totalorder %s2020_s29, %s2014_s28 }
 0x2bd   : > { %p2017_p11 = pneg %p2016_p10 }
 0x2be   : > { %p2023_p0 = por %p2022_p13, %p2021_p12 }
 0x2c0   : > { %p2024_p2 = pnand %p2023_p0, %p2017_p11 }
 0x2c2   : > { %2027 = shalt.err (!%p2024_p2)
}
 0x2c3   : > { %s2028_s10 = scalar_lea.hbm %s4276_s12, 2048  ;;  %s2032_s9 = scalar_lea.hbm %s4389_s2, 4096 }
 0x2c4   : > { %p2029_p9 = scmp.ne.s32.totalorder %s4276_s12, %s2028_s10  ;;  %p2033_p7 = scmp.lt.u32.totalorder %s4276_s12, %s4389_s2 }
 0x2c5   : > { %p2034_p3 = scmp.lt.u32.totalorder %s2032_s9, %s2028_s10  ;;  %p2036_p1 = scmp.lt.u32.totalorder %s2028_s10, %s4276_s12 }
 0x2c6   : > { %p2030_p6 = pnand %p2029_p9, %p4620_p4 }
 0x2c7   : > { %p2035_p8 = por %p2034_p3, %p2033_p7 }
 0x2c8   : > { %p2031_p5 = pneg %p2030_p6 }
 0x2c9   : > { %p2037_p10 = por %p2036_p1, %p2035_p8 }
 0x2cb   : > { %p2038_p11 = pnand %p2037_p10, %p2031_p5 }
 0x2cd   : > { %2041 = shalt.err (!%p2038_p11)
}
 0x2ce   : > { %s2183_s1 = smov 128   ;;  %s2184_s23 = smov 8  }
 0x2cf   : > { %1833 = dma.vmem_to_hbm [thread:$0]  (%p4620_p4), %s4279_s22, 2048, %s4276_s12, %s4283_s5, %s2183_s1, %s2183_s1, %s2184_s23  }
 0x2d0   : > { %s1820_s28 = sshll.u32 %s2156_s18, 4  ;;  %s1826_s20 = smul.u32 48, %s2160_s19 }
 0x2d1   : > { %s1667_s26 = sshll.u32 %s3661_s8, 4  ;;  %s1636_s30 = scalar_lea.sflag [#allocation9], %s2386_s15  ;;  %s4313_s26 = int_to_ptr.vmem [resolvable:$true] %s1667_s26 }
 0x2d2   : > { %s1664_s29 = sadd.s32 %s1826_s20, %s1820_s28  ;;  %s2042_s24 = scalar_lea.vmem %s4313_s26, 2048 }
 0x2d3   : > { %s1821_s10 = sshll.u32 %s1664_s29, 7  ;;  %p2043_p12 = scmp.ne.s32.totalorder %s4313_s26, %s2042_s24 }
 0x2d4   : > { %s4318_s9 = scalar_lea.hbm %s4390_s3, %s1821_s10  ;;  %p4621_p13 = scmp.ne.s32.totalorder %s4453_s4, 0 }
 0x2d5   : > { %s2185_s18 = smov [#allocation8]  }
 0x2d6   : > { %p2044_p4 = pnand %p2043_p12, %p4621_p13  ;;  %s2046_s19 = sshll.u32 %s2185_s18, 4  ;;  %s2047_s19 = int_to_ptr.vmem [resolvable:$false] %s2046_s19 }
 0x2d7   : > { %s2048_s8 = scalar_lea.vmem %s2047_s19, 4096  ;;  %p2049_p2 = scmp.lt.s32.totalorder %s4313_s26, %s2047_s19 }
 0x2d8   : > { %p2045_p0 = pneg %p2044_p4  ;;  %p2050_p9 = scmp.lt.s32.totalorder %s2048_s8, %s2042_s24 }
 0x2da   : > { %p2051_p6 = por %p2050_p9, %p2049_p2 }
 0x2dc   : > { %p2052_p5 = pnand %p2051_p6, %p2045_p0 }
 0x2de   : > { %2055 = shalt.err (!%p2052_p5)
}
 0x2df   : > { %s2056_s12 = scalar_lea.hbm %s4318_s9, 2048  ;;  %s2060_s25 = scalar_lea.hbm %s4390_s3, 12288 }
 0x2e0   : > { %p2057_p7 = scmp.ne.s32.totalorder %s4318_s9, %s2056_s12  ;;  %p2061_p1 = scmp.lt.u32.totalorder %s4318_s9, %s4390_s3 }
 0x2e1   : > { %p2062_p10 = scmp.lt.u32.totalorder %s2060_s25, %s2056_s12  ;;  %p2064_p12 = scmp.lt.u32.totalorder %s2056_s12, %s4318_s9 }
 0x2e2   : > { %p2058_p3 = pnand %p2057_p7, %p4621_p13 }
 0x2e3   : > { %p2063_p11 = por %p2062_p10, %p2061_p1 }
 0x2e4   : > { %p2059_p8 = pneg %p2058_p3 }
 0x2e5   : > { %p2065_p4 = por %p2064_p12, %p2063_p11 }
 0x2e7   : > { %p2066_p0 = pnand %p2065_p4, %p2059_p8 }
 0x2e9   : > { %2069 = shalt.err (!%p2066_p0)
}
 0x2ea   : > { %1834 = dma.vmem_to_hbm [thread:$0]  (%p4621_p13), %s4313_s26, 2048, %s4318_s9, %s1636_s30, %s2183_s1, %s2183_s1, %s2184_s23  }
 0x2eb PF: > { %s4622_s29 = sld [smem:[#allocation17_spill]]  ;;  %s4623_s10 = sld [smem:[#allocation14_spill]] }
 0x2ec   : > { %s4624_s11 = sld [smem:[#allocation18_spill]] }
 0x2f1   : > { %p1855_p2 = scmp.ge.s32.totalorder %s4622_s29, 2  ;;  %s1682_s7 = sand.u32 1, %s4623_s10  }
 0x2f2   : > { %p4625_p9 = scmp.ne.s32.totalorder %s4624_s11, 0  ;;  %s1683_s24 = scalar_lea.sflag [#allocation4], %s1682_s7 }
 0x2f4   : > { %p1846_p6 = pnand %p1855_p2, %p4625_p9 }
 0x2f6   : > { %2123 = dma.done.wait (!%p1846_p6), %s1683_s24, 2048  }
 0x2f7   : > { %2125 = vsyncadd (!%p1846_p6), %s1683_s24, 4294965248  ;;  %s4626_s4 = sld [smem:[#allocation15_spill]]  ;;  %s4627_s18 = sld [smem:[#allocation19_spill]] }
 0x2fd   : > { %s1691_s19 = sand.u32 1, %s4626_s4   ;;  %p4628_p5 = scmp.ne.s32.totalorder %s4627_s18, 0 }
 0x2fe   : > { %s1692_s15 = scalar_lea.sflag [#allocation9], %s1691_s19 }
 0x2ff   : > { %p1849_p7 = pnand %p1855_p2, %p4628_p5 }
 0x301   : > { %2127 = dma.done.wait (!%p1849_p7), %s1692_s15, 2048  }
 0x302   : > { %2129 = vsyncadd (!%p1849_p7), %s1692_s15, 4294965248  ;;  %s24_s22 = sadd.s32 1, %s4622_s29   ;;  %s4629_s18 = sld [smem:[#allocation16_spill]] }
 0x303   : > { %p21_p13 = scmp.ge.s32.totalorder %s24_s22, 8   ;;  %s4630_s20 = sld [smem:[#allocation20_spill]] }
 0x304   : > { %s4631_s1 = sld [smem:[#allocation21_spill]]  ;;  %s4632_s12 = smov %s2136_s13 }
 0x305   : > { %s4633_s13 = smov %s2140_s14  ;;  %s4634_s14 = smov %s2348_s6 }
 0x306   : > { %s4635_s15 = smov %s2148_s16  ;;  %s4636_s16 = smov %s2152_s17 }
 0x307   : > { %s4637_s17 = smov %s2353_s27  ;;  %s4638_s19 = smov %s2168_s21 }
 0x308   :  { %23 = sbr.rel (!%p21_p13) target bundleno = 14 (0xe), region = 103 }
 0x30a   : > { %s4639_s21 = smov %s4631_s1 }
 0x30f   :  { %1697 = vsyncpa [#allocation3], 1 }
 0x310   :  { %1699 = vsyncpa [#allocation3 + $0x1], 1 }
 0x311   :  { %1700 = vsyncpa [#allocation4], 1 }
 0x312   :  { %1702 = vsyncpa [#allocation4 + $0x1], 1 }
 0x313   :  { %1703 = vsyncpa [#allocation9], 1 }
 0x314   :  { %1705 = vsyncpa [#allocation9 + $0x1], 1 }
 0x315   :  { %1706 = vsyncpa [#allocation5], 1 }
 0x316   :  { %1708 = vsyncpa [#allocation5 + $0x1], 1 }

</bundles_post_ra>
